<compile_context>
chip_gen: v7x
topology: tpu7x:2x2x1
jax: 0.10.0
libtpu: 0.0.40
codegen_flags: <defaults>
</compile_context>

<pallas_src>
import numpy as np
import jax
import jax.numpy as jnp
from jax.experimental import pallas as pl
from jax.experimental.pallas import tpu as pltpu


# ----------------------------------------------------------------------------
# Pallas kernel: PointConv message MLP + count-masked max aggregation
# Grid: (M_pad // tm, K // KC).  Axis 0 tiles centers ("parallel"), axis 1 streams the
# neighbor dimension in chunks of KC slots ("arbitrary" reduction, accumulator in scratch).
# ----------------------------------------------------------------------------
def pointconv_kernel(msg_ref, cnt_ref, w1_ref, b1_ref, w2_ref, b2_ref,
                     out_ref, h_ref, acc_ref):
    c = pl.program_id(1)
    nc = pl.num_programs(1)
    tm, F = out_ref.shape
    hid = h_ref.shape[1]
    kc = h_ref.shape[0] // tm

    @pl.when(c == 0)
    def _():
        acc_ref[...] = jnp.zeros_like(acc_ref)

    # ---- layer 1 (neighbor-packed): (tm, kc*din) x (kc*din, kc*hid), contraction = 128 ----
    h = jnp.dot(msg_ref[...], w1_ref[...], preferred_element_type=jnp.float32)
    h = jnp.maximum(h + b1_ref[...], 0.0).astype(jnp.bfloat16)          # (tm, kc*hid)

    # ---- unpack packed hidden lanes -> per-edge rows via VMEM scratch ----
    # static 128-lane slices + sublane-aligned stores (tm multiple of 16); avoids a
    # lane->sublane value relayout that Mosaic may lower poorly.
    for k in range(kc):
        h_ref[k * tm:(k + 1) * tm, :] = h[:, k * hid:(k + 1) * hid]

    # ---- layer 2: one MXU pass over all kc*tm edge rows, w2 loaded once ----
    o = jnp.dot(h_ref[...], w2_ref[...], preferred_element_type=jnp.float32)
    o = jnp.maximum(o + b2_ref[...], 0.0)                               # (kc*tm, F) f32, o >= 0
    o = o.reshape(kc, tm, F)                                            # leading-dim split: layout-free

    # ---- count-masked max over this chunk's neighbor slots, folded into the accumulator ----
    # valid slots are packed at the front of each neighbor row, so a per-center count suffices.
    slot = jax.lax.broadcasted_iota(jnp.int32, (kc, tm, 1), 0) + c * kc
    mask = (slot < cnt_ref[...][None, :, :]).astype(jnp.float32)
    # mask-by-zero is only valid because layer 2 ends in ReLU (o >= 0); if the final
    # activation ever changes, switch back to an additive -inf / jnp.where mask.
    acc_ref[...] = jnp.maximum(acc_ref[...], jnp.max(o * mask, axis=0))

    @pl.when(c == nc - 1)
    def _():
        out_ref[...] = acc_ref[...]


def _pick_tm(m):
    """Row tile: multiple of 16 (bf16 sublane tile), capped at 128, small enough to keep
    >= ~8 row tiles when M allows so a v7x megacore gets >= 4 pipelined steps per core."""
    tm = (m // 8) // 16 * 16
    return int(max(16, min(128, tm)))


def pointconv_mlp_max(msg, counts, w1, b1, w2, b2, *, kc=16, tm=None):
    """msg:(M,K,DIN_PAD) bf16, counts:(M,1) int32, w1:(DIN_PAD,H) bf16, b1:(1,H) f32,
    w2:(H,F) bf16, b2:(1,F) f32 -> (M,F) f32."""
    M, K, din = msg.shape
    H = w1.shape[1]
    F = w2.shape[1]
    assert din == w1.shape[0] and H == w2.shape[0]
    assert K % kc == 0 and (kc * din) % 128 == 0 and H % 128 == 0 and F % 128 == 0
    num_chunks = K // kc

    if tm is None:
        tm = _pick_tm(M)
    M_pad = pl.cdiv(M, tm) * tm

    # free row-major reshape: neighbor chunk c of center i lives in lanes [c*128, (c+1)*128)
    msg2 = msg.reshape(M, K * din)
    if M_pad != M:
        msg2 = jnp.pad(msg2, ((0, M_pad - M), (0, 0)))
        counts = jnp.pad(counts, ((0, M_pad - M), (0, 0)))   # padded centers: count 0 -> output 0

    # block-diagonal layer-1 weight / tiled bias (constant-folded under jit)
    w1_bd = jnp.kron(jnp.eye(kc, dtype=jnp.float32),
                     w1.astype(jnp.float32)).astype(jnp.bfloat16)       # (kc*din, kc*H) bf16
    b1_bd = jnp.tile(b1, (1, kc))                                       # (1, kc*H) f32

    # VMEM @ tm=128: msg 2x32 KiB, grid-invariant weights ~1.1 MiB (default double buffer
    # kept; Buffered(1) would save ~0.6 MiB but isn't needed), h scratch 512 KiB, acc 64 KiB,
    # out 2x64 KiB, per-chunk f32 intermediates ~2 MiB  =>  < 5 MiB, inside scoped VMEM on
    # v5e (16 MiB), v6e (32 MiB) and v7x (32 MiB of 64 physical).
    out = pl.pallas_call(
        pointconv_kernel,
        out_shape=jax.ShapeDtypeStruct((M_pad, F), jnp.float32),
        grid_spec=pltpu.PrefetchScalarGridSpec(
            num_scalar_prefetch=0,
            grid=(M_pad // tm, num_chunks),
            in_specs=[
                # lane-dense msg chunk; default double buffer already hides the DMA
                # (compute-bound) — do not raise to Buffered(3).
                pl.BlockSpec((tm, kc * din), lambda i, c: (i, c)),
                pl.BlockSpec((tm, 1), lambda i, c: (i, 0)),
                pl.BlockSpec((kc * din, kc * H), lambda i, c: (0, 0)),
                pl.BlockSpec((1, kc * H), lambda i, c: (0, 0)),
                pl.BlockSpec((H, F), lambda i, c: (0, 0)),
                pl.BlockSpec((1, F), lambda i, c: (0, 0)),
            ],
            out_specs=pl.BlockSpec((tm, F), lambda i, c: (i, 0)),
            scratch_shapes=[
                pltpu.VMEM((kc * tm, H), jnp.bfloat16),   # unpacked per-edge hidden rows
                pltpu.VMEM((tm, F), jnp.float32),         # running masked max
            ],
        ),
        compiler_params=pltpu.CompilerParams(
            dimension_semantics=("parallel", "arbitrary")),
    )(msg2, counts, w1_bd, b1_bd, w2, b2)
    return out[:M]


# ----------------------------------------------------------------------------
# Glue (plain JAX): farthest point sampling + radius neighbor search
# TODO(synk): fps / radius are data-dependent, variable-length index ops with no clean
#             static-shape Pallas equivalent; they stay in plain JAX.
# ----------------------------------------------------------------------------
def fps_single(pos, in_batch_mask, start_idx, n_sample):
    """Iterative farthest point sampling restricted to one batch segment."""
    min_d = jnp.where(in_batch_mask, jnp.inf, -jnp.inf)
    sel = jnp.zeros((n_sample,), jnp.int32).at[0].set(jnp.int32(start_idx))

    def body(i, carry):
        min_d, sel = carry
        last = sel[i - 1]
        d = jnp.sum((pos - pos[last]) ** 2, axis=-1)
        min_d = jnp.minimum(min_d, jnp.where(in_batch_mask, d, -jnp.inf))
        nxt = jnp.argmax(min_d).astype(jnp.int32)
        sel = sel.at[i].set(nxt)
        return (min_d, sel)

    _, sel = jax.lax.fori_loop(1, n_sample, body, (min_d, sel))
    return sel


def build_neighbors(x, pos, batch, idx, r, k_max):
    """Dense/padded equivalent of radius(pos, pos[idx], r, ..., max_num_neighbors=k_max).
    Valid neighbor slots are packed at the front of each row, so a per-center count suffices."""
    N = pos.shape[0]
    pos_c = pos[idx]                       # (M, 3)  sampled centers
    batch_c = batch[idx]                   # (M,)
    d2 = jnp.sum((pos_c[:, None, :] - pos[None, :, :]) ** 2, axis=-1)      # (M, N)
    valid = (d2 <= r * r) & (batch_c[:, None] == batch[None, :])           # (M, N)
    # top_k on a masked key instead of a full (M, N) argsort (valid first, then by index)
    ar = jnp.arange(N, dtype=jnp.int32)
    key = jnp.where(valid, N - ar, -ar)
    _, order = jax.lax.top_k(key, k_max)                                   # (M, K)
    nbr_valid = jnp.take_along_axis(valid, order, axis=1)                  # (M, K)
    counts = jnp.sum(nbr_valid, axis=1).astype(jnp.int32)[:, None]         # (M, 1)
    x_nbr = x[order]                                                       # (M, K, C)
    rel = pos[order] - pos_c[:, None, :]                                   # (M, K, 3)
    feat = jnp.concatenate([x_nbr, rel], axis=-1)                          # (M, K, C+3)
    pad_ch = (-feat.shape[-1]) % 8                                         # pad DIN 7 -> 8
    if pad_ch:
        feat = jnp.pad(feat, ((0, 0), (0, 0), (0, pad_ch)))
    msg = feat.astype(jnp.bfloat16)                                        # halve HBM traffic
    return msg, counts, pos_c, batch_c


def sa_module_forward(x, pos, batch, params, *, ratio, r, k_max, batch_counts, tm=None):
    w1, b1, w2, b2 = params                # kernel-ready: w1:(DIN_PAD,H) bf16, b1:(1,H) f32, ...
    N = pos.shape[0]
    # FPS per batch segment (deterministic start = first point of each segment)
    idx_parts, off = [], 0
    for n_b in batch_counts:
        n_s = int(np.ceil(n_b * ratio))
        ar = jnp.arange(N)
        mask_b = (ar >= off) & (ar < off + n_b)
        idx_parts.append(fps_single(pos, mask_b, off, n_s))
        off += n_b
    idx = jnp.concatenate(idx_parts)
    msg, counts, pos_c, batch_c = build_neighbors(x, pos, batch, idx, r, k_max)
    x_out = pointconv_mlp_max(msg, counts, w1, b1, w2, b2, tm=tm)
    return x_out, pos_c, batch_c, msg, counts


def reference_pointconv(msg, counts, w1, b1, w2, b2):
    """Pure-JAX reference of the PointConv hot path (mirrors the kernel's bf16 hidden cast)."""
    K = msg.shape[1]
    m = msg.astype(jnp.float32)
    h = jnp.maximum(m @ w1.astype(jnp.float32) + b1, 0.0)
    h = h.astype(jnp.bfloat16).astype(jnp.float32)
    o = jnp.maximum(h @ w2.astype(jnp.float32) + b2, 0.0)
    valid = jnp.arange(K)[None, :] < counts                 # (M, K)
    o = jnp.where(valid[..., None], o, -jnp.inf)
    return jnp.max(o, axis=1)


# ----------------------------------------------------------------------------
if __name__ == "__main__":
    key = jax.random.PRNGKey(0)
    B = 2            # batches
    N_PER = 128      # points per batch
    N = B * N_PER
    C = 4            # input feature channels
    HID = 128        # lane-dense (multiple of 128)
    OUT = 128
    RATIO = 0.5
    R = 0.5
    K_MAX = 64       # max_num_neighbors (matches the PyTorch module)

    kx, kp, k1, k2, k3, k4 = jax.random.split(key, 6)
    x = jax.random.normal(kx, (N, C), jnp.float32)
    pos = jax.random.uniform(kp, (N, 3), jnp.float32)
    batch = jnp.repeat(jnp.arange(B, dtype=jnp.int32), N_PER)

    DIN = C + 3
    DIN_PAD = ((DIN + 7) // 8) * 8
    w1 = 0.2 * jax.random.normal(k1, (DIN, HID), jnp.float32)
    b1 = 0.05 * jax.random.normal(k2, (HID,), jnp.float32)
    w2 = 0.2 * jax.random.normal(k3, (HID, OUT), jnp.float32)
    b2 = 0.05 * jax.random.normal(k4, (OUT,), jnp.float32)

    # kernel-ready params: zero-pad w1 rows to DIN_PAD, weights in bf16, biases f32 (1, H)
    w1p = jnp.zeros((DIN_PAD, HID), jnp.float32).at[:DIN].set(w1).astype(jnp.bfloat16)
    w2b = w2.astype(jnp.bfloat16)
    b1r = b1.reshape(1, -1)
    b2r = b2.reshape(1, -1)
    params = (w1p, b1r, w2b, b2r)

    x_out, pos_out, batch_out, msg, counts = sa_module_forward(
        x, pos, batch, params, ratio=RATIO, r=R, k_max=K_MAX,
        batch_counts=[N_PER, N_PER], tm=None)
    jax.block_until_ready((x_out, pos_out, batch_out))

    # correctness check against a pure-JAX reference of the PointConv hot path
    ref = reference_pointconv(msg, counts, w1p, b1r, w2b, b2r)
    M = B * int(np.ceil(N_PER * RATIO))
    assert x_out.shape == (M, OUT)
    assert pos_out.shape == (M, 3)
    assert batch_out.shape == (M,)
    np.testing.assert_allclose(np.asarray(x_out), np.asarray(ref), rtol=5e-3, atol=5e-3)

    print("KERNEL_OK")
</pallas_src>

<mosaic_0001>
module attributes {stable_mosaic.version = 11 : i64} {
  func.func @pointconv_kernel(%arg0: i32, %arg1: i32, %arg2: memref<16x128xbf16, #tpu.memory_space<vmem>>, %arg3: memref<16x1xi32, #tpu.memory_space<vmem>>, %arg4: memref<128x2048xbf16, #tpu.memory_space<vmem>>, %arg5: memref<1x2048xf32, #tpu.memory_space<vmem>>, %arg6: memref<128x128xbf16, #tpu.memory_space<vmem>>, %arg7: memref<1x128xf32, #tpu.memory_space<vmem>>, %arg8: memref<16x128xf32, #tpu.memory_space<vmem>>, %arg9: memref<256x128xbf16, #tpu.memory_space<vmem>>, %arg10: memref<16x128xf32, #tpu.memory_space<vmem>>) attributes {dimension_semantics = [#tpu.dimension_semantics<parallel>, #tpu.dimension_semantics<arbitrary>], iteration_bounds = array<i64: 8, 4>, scalar_prefetch = 0 : i64, scratch_operands = 2 : i64, tpu.core_type = #tpu.core_type<tc>, window_params = [{transform_indices = @transform_0, window_bounds = array<i64: 16, 128>}, {transform_indices = @transform_1, window_bounds = array<i64: 16, 1>}, {pipeline_mode = #tpu.pipeline_mode<synchronous>, transform_indices = @transform_2, window_bounds = array<i64: 128, 2048>}, {pipeline_mode = #tpu.pipeline_mode<synchronous>, transform_indices = @transform_3, window_bounds = array<i64: 1, 2048>}, {pipeline_mode = #tpu.pipeline_mode<synchronous>, transform_indices = @transform_4, window_bounds = array<i64: 128, 128>}, {pipeline_mode = #tpu.pipeline_mode<synchronous>, transform_indices = @transform_5, window_bounds = array<i64: 1, 128>}, {transform_indices = @transform_6, window_bounds = array<i64: 16, 128>}]} {
    %c0_i32 = arith.constant 0 : i32
    %0 = arith.cmpi eq, %arg1, %c0_i32 : i32
    %1 = arith.extui %0 : i1 to i32
    %c0_i32_0 = arith.constant 0 : i32
    %2 = arith.cmpi ne, %1, %c0_i32_0 : i32
    scf.if %2 {
      %cst_40 = arith.constant 0.000000e+00 : f32
      %72 = vector.broadcast %cst_40 : f32 to vector<16x128xf32>
      %c0_41 = arith.constant 0 : index
      %c0_42 = arith.constant 0 : index
      %73 = vector.load %arg10[%c0_41, %c0_42] : memref<16x128xf32, #tpu.memory_space<vmem>>, vector<16x128xf32>
      tpu.vector_store %arg10[%c0_41, %c0_42], %72 {strides = array<i32>} : memref<16x128xf32, #tpu.memory_space<vmem>>, vector<16x128xf32>,
    } else {
    }
    %c0 = arith.constant 0 : index
    %c0_1 = arith.constant 0 : index
    %3 = vector.load %arg2[%c0, %c0_1] : memref<16x128xbf16, #tpu.memory_space<vmem>>, vector<16x128xbf16>
    %c0_2 = arith.constant 0 : index
    %c0_3 = arith.constant 0 : index
    %4 = vector.load %arg4[%c0_2, %c0_3] : memref<128x2048xbf16, #tpu.memory_space<vmem>>, vector<128x2048xbf16>
    %cst = arith.constant dense<0.000000e+00> : vector<16x2048xf32>
    %5 = tpu.matmul %3, %4, %cst {dimension_numbers = #tpu.dot_dimension_numbers<[1], [0], [0], [1], [0, 0, 1, 1], [], []>} : vector<16x128xbf16>, vector<128x2048xbf16>, vector<16x2048xf32> -> vector<16x2048xf32>
    %c0_4 = arith.constant 0 : index
    %c0_5 = arith.constant 0 : index
    %6 = vector.load %arg5[%c0_4, %c0_5] : memref<1x2048xf32, #tpu.memory_space<vmem>>, vector<1x2048xf32>
    %7 = vector.broadcast %6 : vector<1x2048xf32> to vector<16x2048xf32>
    %8 = arith.addf %5, %7 : vector<16x2048xf32>
    %cst_6 = arith.constant 0.000000e+00 : f32
    %9 = vector.broadcast %cst_6 : f32 to vector<16x2048xf32>
    %10 = arith.maximumf %8, %9 : vector<16x2048xf32>
    %11 = arith.truncf %10 : vector<16x2048xf32> to vector<16x2048xbf16>
    %12 = vector.extract_strided_slice %11 {offsets = [0, 0], sizes = [16, 128], strides = [1, 1]} : vector<16x2048xbf16> to vector<16x128xbf16>
    %c0_7 = arith.constant 0 : index
    %c0_8 = arith.constant 0 : index
    %13 = vector.load %arg9[%c0_7, %c0_8] : memref<256x128xbf16, #tpu.memory_space<vmem>>, vector<16x128xbf16>
    tpu.vector_store %arg9[%c0_7, %c0_8], %12 {strides = array<i32>} : memref<256x128xbf16, #tpu.memory_space<vmem>>, vector<16x128xbf16>,
    %14 = vector.extract_strided_slice %11 {offsets = [0, 128], sizes = [16, 128], strides = [1, 1]} : vector<16x2048xbf16> to vector<16x128xbf16>
    %c16 = arith.constant 16 : index
    %c0_9 = arith.constant 0 : index
    %15 = vector.load %arg9[%c16, %c0_9] : memref<256x128xbf16, #tpu.memory_space<vmem>>, vector<16x128xbf16>
    tpu.vector_store %arg9[%c16, %c0_9], %14 {strides = array<i32>} : memref<256x128xbf16, #tpu.memory_space<vmem>>, vector<16x128xbf16>,
    %16 = vector.extract_strided_slice %11 {offsets = [0, 256], sizes = [16, 128], strides = [1, 1]} : vector<16x2048xbf16> to vector<16x128xbf16>
    %c32 = arith.constant 32 : index
    %c0_10 = arith.constant 0 : index
    %17 = vector.load %arg9[%c32, %c0_10] : memref<256x128xbf16, #tpu.memory_space<vmem>>, vector<16x128xbf16>
    tpu.vector_store %arg9[%c32, %c0_10], %16 {strides = array<i32>} : memref<256x128xbf16, #tpu.memory_space<vmem>>, vector<16x128xbf16>,
    %18 = vector.extract_strided_slice %11 {offsets = [0, 384], sizes = [16, 128], strides = [1, 1]} : vector<16x2048xbf16> to vector<16x128xbf16>
    %c48 = arith.constant 48 : index
    %c0_11 = arith.constant 0 : index
    %19 = vector.load %arg9[%c48, %c0_11] : memref<256x128xbf16, #tpu.memory_space<vmem>>, vector<16x128xbf16>
    tpu.vector_store %arg9[%c48, %c0_11], %18 {strides = array<i32>} : memref<256x128xbf16, #tpu.memory_space<vmem>>, vector<16x128xbf16>,
    %20 = vector.extract_strided_slice %11 {offsets = [0, 512], sizes = [16, 128], strides = [1, 1]} : vector<16x2048xbf16> to vector<16x128xbf16>
    %c64 = arith.constant 64 : index
    %c0_12 = arith.constant 0 : index
    %21 = vector.load %arg9[%c64, %c0_12] : memref<256x128xbf16, #tpu.memory_space<vmem>>, vector<16x128xbf16>
    tpu.vector_store %arg9[%c64, %c0_12], %20 {strides = array<i32>} : memref<256x128xbf16, #tpu.memory_space<vmem>>, vector<16x128xbf16>,
    %22 = vector.extract_strided_slice %11 {offsets = [0, 640], sizes = [16, 128], strides = [1, 1]} : vector<16x2048xbf16> to vector<16x128xbf16>
    %c80 = arith.constant 80 : index
    %c0_13 = arith.constant 0 : index
    %23 = vector.load %arg9[%c80, %c0_13] : memref<256x128xbf16, #tpu.memory_space<vmem>>, vector<16x128xbf16>
    tpu.vector_store %arg9[%c80, %c0_13], %22 {strides = array<i32>} : memref<256x128xbf16, #tpu.memory_space<vmem>>, vector<16x128xbf16>,
    %24 = vector.extract_strided_slice %11 {offsets = [0, 768], sizes = [16, 128], strides = [1, 1]} : vector<16x2048xbf16> to vector<16x128xbf16>
    %c96 = arith.constant 96 : index
    %c0_14 = arith.constant 0 : index
    %25 = vector.load %arg9[%c96, %c0_14] : memref<256x128xbf16, #tpu.memory_space<vmem>>, vector<16x128xbf16>
    tpu.vector_store %arg9[%c96, %c0_14], %24 {strides = array<i32>} : memref<256x128xbf16, #tpu.memory_space<vmem>>, vector<16x128xbf16>,
    %26 = vector.extract_strided_slice %11 {offsets = [0, 896], sizes = [16, 128], strides = [1, 1]} : vector<16x2048xbf16> to vector<16x128xbf16>
    %c112 = arith.constant 112 : index
    %c0_15 = arith.constant 0 : index
    %27 = vector.load %arg9[%c112, %c0_15] : memref<256x128xbf16, #tpu.memory_space<vmem>>, vector<16x128xbf16>
    tpu.vector_store %arg9[%c112, %c0_15], %26 {strides = array<i32>} : memref<256x128xbf16, #tpu.memory_space<vmem>>, vector<16x128xbf16>,
    %28 = vector.extract_strided_slice %11 {offsets = [0, 1024], sizes = [16, 128], strides = [1, 1]} : vector<16x2048xbf16> to vector<16x128xbf16>
    %c128 = arith.constant 128 : index
    %c0_16 = arith.constant 0 : index
    %29 = vector.load %arg9[%c128, %c0_16] : memref<256x128xbf16, #tpu.memory_space<vmem>>, vector<16x128xbf16>
    tpu.vector_store %arg9[%c128, %c0_16], %28 {strides = array<i32>} : memref<256x128xbf16, #tpu.memory_space<vmem>>, vector<16x128xbf16>,
    %30 = vector.extract_strided_slice %11 {offsets = [0, 1152], sizes = [16, 128], strides = [1, 1]} : vector<16x2048xbf16> to vector<16x128xbf16>
    %c144 = arith.constant 144 : index
    %c0_17 = arith.constant 0 : index
    %31 = vector.load %arg9[%c144, %c0_17] : memref<256x128xbf16, #tpu.memory_space<vmem>>, vector<16x128xbf16>
    tpu.vector_store %arg9[%c144, %c0_17], %30 {strides = array<i32>} : memref<256x128xbf16, #tpu.memory_space<vmem>>, vector<16x128xbf16>,
    %32 = vector.extract_strided_slice %11 {offsets = [0, 1280], sizes = [16, 128], strides = [1, 1]} : vector<16x2048xbf16> to vector<16x128xbf16>
    %c160 = arith.constant 160 : index
    %c0_18 = arith.constant 0 : index
    %33 = vector.load %arg9[%c160, %c0_18] : memref<256x128xbf16, #tpu.memory_space<vmem>>, vector<16x128xbf16>
    tpu.vector_store %arg9[%c160, %c0_18], %32 {strides = array<i32>} : memref<256x128xbf16, #tpu.memory_space<vmem>>, vector<16x128xbf16>,
    %34 = vector.extract_strided_slice %11 {offsets = [0, 1408], sizes = [16, 128], strides = [1, 1]} : vector<16x2048xbf16> to vector<16x128xbf16>
    %c176 = arith.constant 176 : index
    %c0_19 = arith.constant 0 : index
    %35 = vector.load %arg9[%c176, %c0_19] : memref<256x128xbf16, #tpu.memory_space<vmem>>, vector<16x128xbf16>
    tpu.vector_store %arg9[%c176, %c0_19], %34 {strides = array<i32>} : memref<256x128xbf16, #tpu.memory_space<vmem>>, vector<16x128xbf16>,
    %36 = vector.extract_strided_slice %11 {offsets = [0, 1536], sizes = [16, 128], strides = [1, 1]} : vector<16x2048xbf16> to vector<16x128xbf16>
    %c192 = arith.constant 192 : index
    %c0_20 = arith.constant 0 : index
    %37 = vector.load %arg9[%c192, %c0_20] : memref<256x128xbf16, #tpu.memory_space<vmem>>, vector<16x128xbf16>
    tpu.vector_store %arg9[%c192, %c0_20], %36 {strides = array<i32>} : memref<256x128xbf16, #tpu.memory_space<vmem>>, vector<16x128xbf16>,
    %38 = vector.extract_strided_slice %11 {offsets = [0, 1664], sizes = [16, 128], strides = [1, 1]} : vector<16x2048xbf16> to vector<16x128xbf16>
    %c208 = arith.constant 208 : index
    %c0_21 = arith.constant 0 : index
    %39 = vector.load %arg9[%c208, %c0_21] : memref<256x128xbf16, #tpu.memory_space<vmem>>, vector<16x128xbf16>
    tpu.vector_store %arg9[%c208, %c0_21], %38 {strides = array<i32>} : memref<256x128xbf16, #tpu.memory_space<vmem>>, vector<16x128xbf16>,
    %40 = vector.extract_strided_slice %11 {offsets = [0, 1792], sizes = [16, 128], strides = [1, 1]} : vector<16x2048xbf16> to vector<16x128xbf16>
    %c224 = arith.constant 224 : index
    %c0_22 = arith.constant 0 : index
    %41 = vector.load %arg9[%c224, %c0_22] : memref<256x128xbf16, #tpu.memory_space<vmem>>, vector<16x128xbf16>
    tpu.vector_store %arg9[%c224, %c0_22], %40 {strides = array<i32>} : memref<256x128xbf16, #tpu.memory_space<vmem>>, vector<16x128xbf16>,
    %42 = vector.extract_strided_slice %11 {offsets = [0, 1920], sizes = [16, 128], strides = [1, 1]} : vector<16x2048xbf16> to vector<16x128xbf16>
    %c240 = arith.constant 240 : index
    %c0_23 = arith.constant 0 : index
    %43 = vector.load %arg9[%c240, %c0_23] : memref<256x128xbf16, #tpu.memory_space<vmem>>, vector<16x128xbf16>
    tpu.vector_store %arg9[%c240, %c0_23], %42 {strides = array<i32>} : memref<256x128xbf16, #tpu.memory_space<vmem>>, vector<16x128xbf16>,
    %c0_24 = arith.constant 0 : index
    %c0_25 = arith.constant 0 : index
    %44 = vector.load %arg9[%c0_24, %c0_25] : memref<256x128xbf16, #tpu.memory_space<vmem>>, vector<256x128xbf16>
    %c0_26 = arith.constant 0 : index
    %c0_27 = arith.constant 0 : index
    %45 = vector.load %arg6[%c0_26, %c0_27] : memref<128x128xbf16, #tpu.memory_space<vmem>>, vector<128x128xbf16>
    %cst_28 = arith.constant dense<0.000000e+00> : vector<256x128xf32>
    %46 = tpu.matmul %44, %45, %cst_28 {dimension_numbers = #tpu.dot_dimension_numbers<[1], [0], [0], [1], [0, 0, 1, 1], [], []>} : vector<256x128xbf16>, vector<128x128xbf16>, vector<256x128xf32> -> vector<256x128xf32>
    %c0_29 = arith.constant 0 : index
    %c0_30 = arith.constant 0 : index
    %47 = vector.load %arg7[%c0_29, %c0_30] : memref<1x128xf32, #tpu.memory_space<vmem>>, vector<1x128xf32>
    %48 = vector.broadcast %47 : vector<1x128xf32> to vector<256x128xf32>
    %49 = arith.addf %46, %48 : vector<256x128xf32>
    %cst_31 = arith.constant 0.000000e+00 : f32
    %50 = vector.broadcast %cst_31 : f32 to vector<256x128xf32>
    %51 = arith.maximumf %49, %50 : vector<256x128xf32>
    %52 = vector.shape_cast %51 : vector<256x128xf32> to vector<16x16x128xf32>
    %53 = tpu.iota {dimensions = array<i32: 0>} : vector<16x16x1xi32>
    %c16_i32 = arith.constant 16 : i32
    %54 = arith.muli %arg1, %c16_i32 : i32
    %55 = vector.broadcast %54 : i32 to vector<16x16x1xi32>
    %56 = arith.addi %53, %55 : vector<16x16x1xi32>
    %c0_32 = arith.constant 0 : index
    %c0_33 = arith.constant 0 : index
    %57 = vector.load %arg3[%c0_32, %c0_33] : memref<16x1xi32, #tpu.memory_space<vmem>>, vector<16x1xi32>
    %58 = vector.shape_cast %57 : vector<16x1xi32> to vector<1x16x1xi32>
    %59 = vector.broadcast %58 : vector<1x16x1xi32> to vector<16x16x1xi32>
    %60 = arith.cmpi slt, %56, %59 : vector<16x16x1xi32>
    %61 = arith.extui %60 : vector<16x16x1xi1> to vector<16x16x1xi32>
    %62 = arith.sitofp %61 : vector<16x16x1xi32> to vector<16x16x1xf32>
    %c0_34 = arith.constant 0 : index
    %c0_35 = arith.constant 0 : index
    %63 = vector.load %arg10[%c0_34, %c0_35] : memref<16x128xf32, #tpu.memory_space<vmem>>, vector<16x128xf32>
    %64 = vector.broadcast %62 : vector<16x16x1xf32> to vector<16x16x128xf32>
    %65 = arith.mulf %52, %64 : vector<16x16x128xf32>
    %cst_36 = arith.constant dense<0xFF800000> : vector<16x128xf32>
    %66 = vector.multi_reduction <maximumf>, %65, %cst_36 [0] : vector<16x16x128xf32> to vector<16x128xf32>
    %67 = arith.maximumf %63, %66 : vector<16x128xf32>
    %c0_37 = arith.constant 0 : index
    %c0_38 = arith.constant 0 : index
    %68 = vector.load %arg10[%c0_37, %c0_38] : memref<16x128xf32, #tpu.memory_space<vmem>>, vector<16x128xf32>
    tpu.vector_store %arg10[%c0_37, %c0_38], %67 {strides = array<i32>} : memref<16x128xf32, #tpu.memory_space<vmem>>, vector<16x128xf32>,
    %c3_i32 = arith.constant 3 : i32
    %69 = arith.cmpi eq, %arg1, %c3_i32 : i32
    %70 = arith.extui %69 : i1 to i32
    %c0_i32_39 = arith.constant 0 : i32
    %71 = arith.cmpi ne, %70, %c0_i32_39 : i32
    scf.if %71 {
      %c0_40 = arith.constant 0 : index
      %c0_41 = arith.constant 0 : index
      %72 = vector.load %arg10[%c0_40, %c0_41] : memref<16x128xf32, #tpu.memory_space<vmem>>, vector<16x128xf32>
      %c0_42 = arith.constant 0 : index
      %c0_43 = arith.constant 0 : index
      %73 = vector.load %arg8[%c0_42, %c0_43] : memref<16x128xf32, #tpu.memory_space<vmem>>, vector<16x128xf32>
      tpu.vector_store %arg8[%c0_42, %c0_43], %72 {strides = array<i32>} : memref<16x128xf32, #tpu.memory_space<vmem>>, vector<16x128xf32>,
    } else {
    }
    return
  }
  func.func @transform_0(%arg0: i32, %arg1: i32) -> (i32, i32) {
    %c0_i32 = arith.constant 0 : i32
    return %arg0, %arg1 : i32, i32
  }
  func.func @transform_1(%arg0: i32, %arg1: i32) -> (i32, i32) {
    %c0_i32 = arith.constant 0 : i32
    %c0_i32_0 = arith.constant 0 : i32
    return %arg0, %c0_i32 : i32, i32
  }
  func.func @transform_2(%arg0: i32, %arg1: i32) -> (i32, i32) {
    %c0_i32 = arith.constant 0 : i32
    %c0_i32_0 = arith.constant 0 : i32
    %c0_i32_1 = arith.constant 0 : i32
    return %c0_i32, %c0_i32_0 : i32, i32
  }
  func.func @transform_3(%arg0: i32, %arg1: i32) -> (i32, i32) {
    %c0_i32 = arith.constant 0 : i32
    %c0_i32_0 = arith.constant 0 : i32
    %c0_i32_1 = arith.constant 0 : i32
    return %c0_i32, %c0_i32_0 : i32, i32
  }
  func.func @transform_4(%arg0: i32, %arg1: i32) -> (i32, i32) {
    %c0_i32 = arith.constant 0 : i32
    %c0_i32_0 = arith.constant 0 : i32
    %c0_i32_1 = arith.constant 0 : i32
    return %c0_i32, %c0_i32_0 : i32, i32
  }
  func.func @transform_5(%arg0: i32, %arg1: i32) -> (i32, i32) {
    %c0_i32 = arith.constant 0 : i32
    %c0_i32_0 = arith.constant 0 : i32
    %c0_i32_1 = arith.constant 0 : i32
    return %c0_i32, %c0_i32_0 : i32, i32
  }
  func.func @transform_6(%arg0: i32, %arg1: i32) -> (i32, i32) {
    %c0_i32 = arith.constant 0 : i32
    %c0_i32_0 = arith.constant 0 : i32
    return %arg0, %c0_i32 : i32, i32
  }
}

</mosaic_0001>

<bundles_post_ra>
// kernel: tpu_custom_call.1
= control target key start
LH: loop header
LB: loop body
LE: loop exit
PB: predicated region body
PF: predicated region fallthrough
CT: control target
= control target key end

     0   :  { %s3591_s0 = inlined_call_operand.hbm [shape: bf16[128,512], index: 0, kind: input, shape index: {}]   ;;  %s3592_s1 = inlined_call_operand.vmem [shape: s32[128,1], index: 1, kind: input, shape index: {}]   ;;  %s3593_s2 = inlined_call_operand.hbm [shape: bf16[128,2048], index: 2, kind: input, shape index: {}]   ;;  %s3594_s3 = inlined_call_operand.vmem [shape: f32[1,2048], index: 3, kind: input, shape index: {}]   ;;  %s3595_s4 = inlined_call_operand.vmem [shape: bf16[128,128], index: 4, kind: input, shape index: {}]   ;;  %s3596_s5 = inlined_call_operand.vmem [shape: f32[1,128], index: 5, kind: input, shape index: {}]   ;;  %s3597_s6 = inlined_call_operand.hbm [shape: f32[128,128], index: 6, kind: output, shape index: {}]  }
   0x1   :  { %3615 = sst [smem:[#allocation20_spill]] %s3593_s2 }
   0x2   :  { %3616 = sst [smem:[#allocation21_spill]] %s3597_s6 }
   0x3   :  { %11 = vsyncpa [#allocation5], 0 }
   0x4   :  { %13 = vsyncpa [#allocation5 + $0x1], 0 }
   0x5   :  { %14 = vsyncpa [#allocation8], 0 }
   0x6   :  { %15 = vsyncpa [#allocation6], 0 }
   0x7   :  { %17 = vsyncpa [#allocation6 + $0x1], 0  ;;  %s3066_s21 = smov 0   ;;  %s3068_s22 = smov 0  }
   0x8   :  { %s3070_s23 = smov 0   ;;  %s3072_s24 = smov 0  }
   0x9   :  { %s3074_s25 = smov 0   ;;  %s3076_s26 = smov 0  }
   0xa   :  { %s3078_s27 = smov 0   ;;  %s3080_s28 = smov 0  }
   0xb   :  { %s3082_s29 = smov 0   ;;  %s3084_s30 = smov 0  }
   0xc   :  { %s3086_s7 = smov 0  }
   0xd LB: > { %3617 = sst [smem:[#allocation13_spill]] %s2977_s21  ;;  %s2353_s8 = sadd.s32 4294967295, %s3017_s7   ;;  %s3017_s7 = sphi %s3086_s7, %s23_s7   ;;  %s3013_s30 = sphi %s3084_s30, %s3657_s30   ;;  %s3009_s29 = sphi %s3082_s29, %s3648_s29   ;;  %s3005_s28 = sphi %s3080_s28, %s3656_s28   ;;  %s3001_s27 = sphi %s3078_s27, %s3647_s27   ;;  %s2997_s26 = sphi %s3076_s26, %s3655_s26   ;;  %s2993_s25 = sphi %s3074_s25, %s3654_s25   ;;  %s2989_s24 = sphi %s3072_s24, %s3653_s24   ;;  %s2985_s23 = sphi %s3070_s23, %s3652_s23   ;;  %s2981_s22 = sphi %s3068_s22, %s3651_s22   ;;  %s2977_s21 = sphi %s3066_s21, %s3650_s21  }
   0xe   : > { %3618 = sst [smem:[#allocation14_spill]] %s3009_s29  ;;  %s2354_s9 = sadd.s32 4294967294, %s3017_s7  }
   0xf   : > { %3619 = sst [smem:[#allocation15_spill]] %s3017_s7  ;;  %p51_p0 = scmp.ne.s32.totalorder %s2997_s26, %s2993_s25 }
  0x10   : > { %p52_p1 = scmp.eq.s32.totalorder %s3017_s7, 0  ;;  %p57_p2 = scmp.ne.s32.totalorder %s2993_s25, %s2989_s24 }
  0x11   : > { %p3126_p3 = scmp.eq.s32.totalorder %s2353_s8, 0  ;;  %p190_p5 = scmp.ne.s32.totalorder %s2985_s23, %s2981_s22 }
  0x12   : > { %p3131_p4 = por %p52_p1, %p51_p0  ;;  %p191_p7 = scmp.eq.s32.totalorder %s2353_s8, 31 }
  0x13   : > { %s3620_s11 = scalar_select %p3126_p3, 1, 0 }
  0x14   : > { %p3139_p6 = por %p3126_p3, %p57_p2  ;;  %p196_p8 = scmp.ne.s32.totalorder %s2981_s22, %s2977_s21 }
  0x15   : > { %p197_p9 = scmp.eq.s32.totalorder %s2354_s9, 31  ;;  %p3145_p10 = por %p191_p7, %p190_p5 }
  0x16   : > { %s3622_s14 = scalar_select %p3139_p6, 1, 0 }
  0x17   : > { %s3623_s15 = scalar_select %p3145_p10, 1, 0 }
  0x18   : > { %p2355_p11 = scmp.ge.s32.totalorder %s3017_s7, 1  ;;  %p3150_p12 = por %p197_p9, %p196_p8 }
  0x19   : > { %3624 = sst [smem:[#allocation16_spill]] %s3623_s15  ;;  %p204_p13 = scmp.lt.s32.totalorder %s3017_s7, 33 }
  0x1a   : > { %s3625_s16 = scalar_select %p3150_p12, 1, 0 }
  0x1b   : > { %p3155_p0 = pnand %p2355_p11, %p204_p13  ;;  %s3019_s18 = smov [#allocation7]  }
  0x1c   : > { %3626 = sst [smem:[#allocation17_spill]] %s3625_s16  ;;  %s216_s19 = sshll.u32 %s3019_s18, 4  ;;  %s217_s19 = int_to_ptr.vmem [resolvable:$true] %s216_s19 }
  0x1d   : > { %s3627_s17 = scalar_select %p3155_p0, 1, 0 }
  0x1e   : > { %p2628_p1 = pneg %p3155_p0  ;;  %p2641_p2 = scmp.lt.s32.totalorder %s3017_s7, 32 }
  0x1f   : > { %s3630_s2 = sld [smem:[#allocation20_spill]] }
  0x20   : > { %p3164_p5 = pnand %p2628_p1, %p3126_p3  ;;  %p3170_p7 = pnand %p2641_p2, %p3131_p4 }
  0x22   : > { %s3629_s24 = scalar_select %p3170_p7, 1, 0 }
  0x23   : > { %p2835_p9 = pneg %p3164_p5 }
  0x25   : > { %s2833_s10 = scalar_lea.hbm %s3630_s2, 16384 }
  0x26   : > { %p2834_p8 = scmp.ne.s32.totalorder %s3630_s2, %s2833_s10  ;;  %p2840_p1 = scmp.lt.u32.totalorder %s2833_s10, %s3630_s2 }
  0x28   : > { %p2836_p11 = pnand %p2835_p9, %p2834_p8 }
  0x2a   : > { %p2837_p13 = pneg %p2836_p11 }
  0x2c   : > { %p2842_p4 = pnand %p2840_p1, %p2837_p13 }
  0x2e   : > { %2845 = shalt.err (!%p2842_p4)
}
  0x2f   : > { %s2846_s13 = scalar_lea.vmem %s217_s19, 16384  ;;  %p2854_p3 = scmp.lt.s32.totalorder %s217_s19, %s217_s19 }
  0x30   : > { %p2847_p2 = scmp.ne.s32.totalorder %s217_s19, %s2846_s13  ;;  %p2855_p6 = scmp.lt.s32.totalorder %s2846_s13, %s2846_s13 }
  0x32   : > { %p2849_p12 = pnand %p2847_p2, %p2835_p9  ;;  %p2856_p0 = por %p2855_p6, %p2854_p3 }
  0x34   : > { %p2850_p10 = pneg %p2849_p12 }
  0x36   : > { %p2857_p7 = pnand %p2856_p0, %p2850_p10 }
  0x38   : > { %2860 = shalt.err (!%p2857_p7)
}
  0x39   : > { %s3020_s12 = smov 1024   ;;  %s3609_s21 = smov 64  }
  0x3a   : > { %2631 = dma.hbm_to_vmem [thread:$0]  (!%p3164_p5), %s3630_s2, 16384, %s217_s19, [#allocation8], %s3020_s12, %s3020_s12, %s3609_s21  }
  0x3b   : > { %s32_s8 = sadd.s32 1, %s3009_s29  ;;  %s35_s9 = sadd.s32 1, %s3013_s30 }
  0x3c   : > { %p33_p3 = scmp.ge.s32.totalorder %s32_s8, 4  ;;  %s239_s18 = sand.u32 1, %s2997_s26  }
  0x3d   : > { %s2358_s13 = sshll.u32 %s239_s18, 3  ;;  %s2546_s7 = sshll.u32 %s3013_s30, 3 }
  0x3e   : > { %s3659_s8 = smov (%p33_p3, %s32_s8), 0  ;;  %s3661_s9 = smov (!%p33_p3, %s35_s9), %s3013_s30 }
  0x3f   : > { %3631 = sst [smem:[#allocation18_spill]] %s3659_s8  ;;  %s40_s20 = ssub.s32 %s3009_s29, %s3659_s8 }
  0x40   : > { %p37_p6 = scmp.ge.s32.totalorder %s3661_s9, 8  ;;  %s249_s6 = sadd.s32 %s3009_s29, %s2546_s7 }
  0x41   : > { %s243_s19 = scalar_lea.vmem [#allocation4], %s2358_s13  ;;  %s2361_s10 = sshll.u32 %s249_s6, 6 }
  0x42   : > { %s252_s12 = sshll.u32 %s243_s19, 4  ;;  %s3663_s9 = smov (%p37_p6, %s3661_s9), 0  ;;  %s3203_s12 = int_to_ptr.vmem [resolvable:$true] %s252_s12 }
  0x43   : > { %3632 = sst [smem:[#allocation19_spill]] %s3663_s9  ;;  %s39_s16 = ssub.s32 %s3013_s30, %s3663_s9 }
  0x44   : > { %s3210_s15 = scalar_lea.hbm %s3591_s0, %s2361_s10  ;;  %s41_s7 = sor.u32 %s40_s20, %s39_s16 }
  0x45   : > { %p178_p10 = scmp.eq.s32.totalorder %s39_s16, 0  ;;  %p42_p12 = scmp.eq.s32.totalorder %s41_s7, 0 }
  0x46   : > { %s3633_s13 = sadd.s32 1, %s2985_s23  ;;  %s3634_s8 = sadd.s32 1, %s2997_s26 }
  0x47   : > { %s3215_s19 = scalar_select %p178_p10, %s2985_s23, %s3633_s13  }
  0x48   : > { %s3220_s6 = scalar_select %p42_p12, %s2997_s26, %s3634_s8  }
  0x49   : > { %s3222_s29 = scalar_lea.sflag [#allocation5], %s239_s18  ;;  %s2861_s9 = scalar_lea.hbm %s3210_s15, 128 }
  0x4a   : > { %p2862_p0 = scmp.ne.s32.totalorder %s3210_s15, %s2861_s9  ;;  %p3635_p5 = scmp.ne.s32.totalorder %s3629_s24, 0 }
  0x4b   : > { %s2866_s20 = scalar_lea.hbm %s3591_s0, 4096  ;;  %p2867_p11 = scmp.lt.u32.totalorder %s3210_s15, %s3591_s0 }
  0x4c   : > { %p2863_p7 = pneg %p3635_p5  ;;  %p2868_p13 = scmp.lt.u32.totalorder %s2866_s20, %s2861_s9 }
  0x4d   : > { %p2870_p4 = scmp.lt.u32.totalorder %s2861_s9, %s3210_s15 }
  0x4e   : > { %p2864_p8 = pnand %p2863_p7, %p2862_p0  ;;  %p2869_p1 = por %p2868_p13, %p2867_p11 }
  0x50   : > { %p2865_p9 = pneg %p2864_p8  ;;  %p2871_p2 = por %p2870_p4, %p2869_p1 }
  0x52   : > { %p2872_p3 = pnand %p2871_p2, %p2865_p9 }
  0x54   : > { %2875 = shalt.err (!%p2872_p3)
}
  0x55   : > { %s2876_s8 = scalar_lea.vmem %s3203_s12, 128  ;;  %s3022_s18 = smov [#allocation4]  }
  0x56   : > { %p2877_p6 = scmp.ne.s32.totalorder %s3203_s12, %s2876_s8  ;;  %s2881_s7 = sshll.u32 %s3022_s18, 4  ;;  %s2882_s7 = int_to_ptr.vmem [resolvable:$false] %s2881_s7 }
  0x57   : > { %s2883_s13 = scalar_lea.vmem %s2882_s7, 256  ;;  %p2884_p0 = scmp.lt.s32.totalorder %s3203_s12, %s2882_s7 }
  0x58   : > { %p2879_p10 = pnand %p2877_p6, %p2863_p7  ;;  %p2885_p8 = scmp.lt.s32.totalorder %s2883_s13, %s2876_s8 }
  0x5a   : > { %p2880_p12 = pneg %p2879_p10  ;;  %p2886_p11 = por %p2885_p8, %p2884_p0 }
  0x5c   : > { %p2887_p13 = pnand %p2886_p11, %p2880_p12 }
  0x5e   : > { %2890 = shalt.err (!%p2887_p13)
}
  0x5f   : > { %s3023_s9 = smov 256   ;;  %s3024_s2 = smov 4  }
  0x60   : > { %s3636_s21 = smov 64   ;;  %p3637_p7 = scmp.ne.s32.totalorder %s3627_s17, 0 }
  0x61   : > { %2635 = dma.hbm_to_vmem [thread:$0]  (!%p3635_p5), %s3210_s15, 128, %s3203_s12, %s3222_s29, %s3023_s9, %s3636_s21, %s3024_s2  }
  0x62   : > { %273 = sbr.rel (%p3637_p7) target bundleno = 769 (0x301), region = 44  ;;  %s275_s20 = sand.u32 (!%p3637_p7), 1, %s2993_s25  }
  0x63   : > { %s3254_s10 = sshll.u32 (!%p3637_p7), %s275_s20, 3  ;;  %s276_s16 = scalar_lea.sflag (!%p3637_p7), [#allocation5], %s275_s20 }
  0x64   : > { %s279_s8 = scalar_lea.vmem (!%p3637_p7), [#allocation4], %s3254_s10  ;;  %p3638_p9 = scmp.ne.s32.totalorder (!%p3637_p7), %s3622_s14, 0 }
  0x69   : > { %2964 = dma.done.wait (%p3638_p9), %s276_s16, 128  }
  0x6a   : > { %2966 = vsyncadd (%p3638_p9), %s276_s16, 4294967168  ;;  %p3639_p1 = scmp.ne.s32.totalorder %s3620_s11, 0 }
  0x6c   : > { %2968 = dma.done.wait (%p3639_p1), [#allocation8], 16384  }
  0x6d   : > { %2970 = vsyncadd (%p3639_p1), [#allocation8], 4294950912  ;;  %s314_s29 = sand.u32 1, %s2981_s22   ;;  %s2366_s15 = sshll.u32 %s3005_s28, 1 }
  0x6e   : > { %s2365_s17 = sshll.u32 %s314_s29, 4  ;;  %p319_p5 = scmp.lt.s32.totalorder %s2366_s15, 15 }
  0x6f   : > { %s3274_s7 = scalar_lea.vmem [#allocation9], %s2365_s17  ;;  %p2368_p4 = scmp.ne.s32.totalorder %s3001_s27, 0 }
  0x70   : > { %s3665_s15 = smov (!%p319_p5, %s2366_s15), 15  ;;  %v3025_v0 = vmov (!%p2368_p4), 0.0  }
  0x71   : > { %s2367_s24 = sshll.u32 %s3665_s15, 3  ;;  %329 = sbr.rel (%p2368_p4) target bundleno = 120 (0x78), region = 56  ;;  %330 = vst [vmem:[#allocation3] sm:$0xff] (!%p2368_p4), %v3025_v0  ;;  %331 = vst [vmem:[#allocation3 + $0x8] sm:$0xff] (!%p2368_p4), %v3025_v0 }
  0x72   : > { %s3272_s14 = scalar_lea.vmem %s3592_s1, %s2367_s24 }
  0x78 PF: > { %v334_v1 = vld [vmem:[#allocation7] sm:$0xff]  ;;  %v3026_v7 = vmov 0   ;;  %v336_v16 = vld [vmem:[#allocation7 + $0x10] sm:$0xff]  ;;  %v335_v55 = vld [vmem:[#allocation7 + $0x8] sm:$0xff]  ;;  %s2507_s9 = sshll.u32 %s3001_s27, 4  ;;  %p2540_p2 = scmp.ne.s32.totalorder %s3001_s27, 3 }
  0x79   : > { %v342_v2 = vld [vmem:[#allocation7 + $0x40] sm:$0xff]  ;;  %1224 = vmatprep.mubr.bf16.mxu1 %v3026_v7  ;;  %1310 = vmatprep.mubr.bf16.mxu0 %v3026_v7  ;;  %v344_v17 = vld [vmem:[#allocation7 + $0x50] sm:$0xff]  ;;  %v343_v57 = vld [vmem:[#allocation7 + $0x48] sm:$0xff] }
  0x7a   : > { %v350_v3 = vld [vmem:[#allocation7 + $0x80] sm:$0xff]  ;;  %v2371_v4 = vcombine.high %v334_v1, %v342_v2  ;;  %v2370_v5 = vcombine.low %v334_v1, %v342_v2  ;;  %2742 = vset.pattern.permute.xlu0 %v3026_v7  ;;  %2753 = vset.pattern.permute.xlu1 %v3026_v7  ;;  %v2375_v19 = vcombine.high %v336_v16, %v344_v17  ;;  %v352_v21 = vld [vmem:[#allocation7 + $0x90] sm:$0xff]  ;;  %v351_v0 = vld [vmem:[#allocation7 + $0x88] sm:$0xff] }
  0x7b   : > { %v358_v6 = vld [vmem:[#allocation7 + $0xc0] sm:$0xff]  ;;  %v2374_v20 = vcombine.low %v336_v16, %v344_v17  ;;  %v360_v24 = vld [vmem:[#allocation7 + $0xd0] sm:$0xff]  ;;  %v2373_v62 = vcombine.high %v335_v55, %v343_v57  ;;  %v359_v1 = vld [vmem:[#allocation7 + $0xc8] sm:$0xff] }
  0x7c   : > { %v2387_v8 = vcombine.high %v350_v3, %v358_v6  ;;  %v366_v9 = vld [vmem:[#allocation7 + $0x100] sm:$0xff]  ;;  %1192 = vmatprep.subr.bf16.mxu1 %v2371_v4  ;;  %v2386_v11 = vcombine.low %v350_v3, %v358_v6  ;;  %1278 = vmatprep.subr.bf16.mxu0 %v2375_v19  ;;  %v2391_v25 = vcombine.high %v352_v21, %v360_v24  ;;  %v368_v26 = vld [vmem:[#allocation7 + $0x110] sm:$0xff]  ;;  %v383_v17 = vld [vmem:[#allocation7 + $0x188] sm:$0xff] }
  0x7d   : > { %v374_v10 = vld [vmem:[#allocation7 + $0x140] sm:$0xff]  ;;  %1193 = vmatpush1.bf16.msra.mxu1 %v2370_v5  ;;  %v376_v27 = vld [vmem:[#allocation7 + $0x150] sm:$0xff]  ;;  %1279 = vmatpush1.bf16.msra.mxu0 %v2374_v20  ;;  %v2390_v29 = vcombine.low %v352_v21, %v360_v24  ;;  %v2372_v5 = vcombine.low %v335_v55, %v343_v57  ;;  %v2389_v6 = vcombine.high %v351_v0, %v359_v1  ;;  %v337_v57 = vld [vmem:[#allocation7 + $0x18] sm:$0xff] }
  0x7e   : > { %1194 = vmatprep.subr.bf16.mxu1 %v2387_v8  ;;  %v2403_v12 = vcombine.high %v366_v9, %v374_v10  ;;  %v382_v13 = vld [vmem:[#allocation7 + $0x180] sm:$0xff]  ;;  %v2402_v15 = vcombine.low %v366_v9, %v374_v10  ;;  %1280 = vmatprep.subr.bf16.mxu0 %v2391_v25  ;;  %v2407_v32 = vcombine.high %v368_v26, %v376_v27  ;;  %v384_v34 = vld [vmem:[#allocation7 + $0x190] sm:$0xff]  ;;  %v367_v9 = vld [vmem:[#allocation7 + $0x108] sm:$0xff] }
  0x7f   : > { %v390_v14 = vld [vmem:[#allocation7 + $0x1c0] sm:$0xff]  ;;  %v392_v35 = vld [vmem:[#allocation7 + $0x1d0] sm:$0xff]  ;;  %v2406_v37 = vcombine.low %v368_v26, %v376_v27  ;;  %v375_v10 = vld [vmem:[#allocation7 + $0x148] sm:$0xff] }
  0x80   : > { %v2419_v18 = vcombine.high %v382_v13, %v390_v14  ;;  %v398_v22 = vld [vmem:[#allocation7 + $0x200] sm:$0xff]  ;;  %v2418_v28 = vcombine.low %v382_v13, %v390_v14  ;;  %v2423_v40 = vcombine.high %v384_v34, %v392_v35  ;;  %v400_v42 = vld [vmem:[#allocation7 + $0x210] sm:$0xff]  ;;  %v2422_v45 = vcombine.low %v384_v34, %v392_v35  ;;  %v399_v25 = vld [vmem:[#allocation7 + $0x208] sm:$0xff] }
  0x81   : > { %1195 = vmatpush1.bf16.msra.mxu1 %v2386_v11  ;;  %v406_v23 = vld [vmem:[#allocation7 + $0x240] sm:$0xff]  ;;  %1281 = vmatpush1.bf16.msra.mxu0 %v2390_v29  ;;  %v408_v43 = vld [vmem:[#allocation7 + $0x250] sm:$0xff]  ;;  %v2388_v14 = vcombine.low %v351_v0, %v359_v1  ;;  %v407_v26 = vld [vmem:[#allocation7 + $0x248] sm:$0xff] }
  0x82   : > { %1196 = vmatprep.subr.bf16.mxu1 %v2403_v12  ;;  %v2435_v30 = vcombine.high %v398_v22, %v406_v23  ;;  %v414_v31 = vld [vmem:[#allocation7 + $0x280] sm:$0xff]  ;;  %v2434_v36 = vcombine.low %v398_v22, %v406_v23  ;;  %1282 = vmatprep.subr.bf16.mxu0 %v2407_v32  ;;  %v2439_v48 = vcombine.high %v400_v42, %v408_v43  ;;  %v416_v50 = vld [vmem:[#allocation7 + $0x290] sm:$0xff]  ;;  %v353_v1 = vld [vmem:[#allocation7 + $0x98] sm:$0xff] }
  0x83   : > { %v422_v33 = vld [vmem:[#allocation7 + $0x2c0] sm:$0xff]  ;;  %v424_v51 = vld [vmem:[#allocation7 + $0x2d0] sm:$0xff]  ;;  %v2438_v53 = vcombine.low %v400_v42, %v408_v43  ;;  %v2404_v22 = vcombine.low %v367_v9, %v375_v10  ;;  %v2437_v32 = vcombine.high %v399_v25, %v407_v26 }
  0x84   : > { %v2451_v38 = vcombine.high %v414_v31, %v422_v33  ;;  %v430_v39 = vld [vmem:[#allocation7 + $0x300] sm:$0xff]  ;;  %v2450_v44 = vcombine.low %v414_v31, %v422_v33  ;;  %v2455_v56 = vcombine.high %v416_v50, %v424_v51  ;;  %v432_v58 = vld [vmem:[#allocation7 + $0x310] sm:$0xff]  ;;  %v2454_v61 = vcombine.low %v416_v50, %v424_v51  ;;  %v415_v31 = vld [vmem:[#allocation7 + $0x288] sm:$0xff] }
  0x85   : > { %1197 = vmatpush1.bf16.msra.mxu1 %v2402_v15  ;;  %v438_v41 = vld [vmem:[#allocation7 + $0x340] sm:$0xff]  ;;  %1283 = vmatpush1.bf16.msra.mxu0 %v2406_v37  ;;  %v440_v59 = vld [vmem:[#allocation7 + $0x350] sm:$0xff]  ;;  %v2405_v15 = vcombine.high %v367_v9, %v375_v10  ;;  %v423_v33 = vld [vmem:[#allocation7 + $0x2c8] sm:$0xff] }
  0x86   : > { %1198 = vmatprep.subr.bf16.mxu1 %v2419_v18  ;;  %v2467_v46 = vcombine.high %v430_v39, %v438_v41  ;;  %v446_v47 = vld [vmem:[#allocation7 + $0x380] sm:$0xff]  ;;  %1284 = vmatprep.subr.bf16.mxu0 %v2423_v40  ;;  %v2466_v52 = vcombine.low %v430_v39, %v438_v41  ;;  %v2471_v63 = vcombine.high %v432_v58, %v440_v59  ;;  %v3283_v2 = vld [vmem:[%s279_s8] sm:$0xff]   ;;  %v391_v18 = vld [vmem:[#allocation7 + $0x1c8] sm:$0xff] }
  0x87   : > { %v454_v49 = vld [vmem:[#allocation7 + $0x3c0] sm:$0xff]  ;;  %v448_v3 = vld [vmem:[#allocation7 + $0x390] sm:$0xff]  ;;  %v2470_v8 = vcombine.low %v432_v58, %v440_v59  ;;  %v2421_v23 = vcombine.high %v383_v17, %v391_v18  ;;  %v2453_v39 = vcombine.high %v415_v31, %v423_v33  ;;  %v431_v40 = vld [vmem:[#allocation7 + $0x308] sm:$0xff] }
  0x88   : > { %v2483_v54 = vcombine.high %v446_v47, %v454_v49  ;;  %v2482_v60 = vcombine.low %v446_v47, %v454_v49  ;;  %v456_v4 = vld [vmem:[#allocation7 + $0x3d0] sm:$0xff]  ;;  %v338_v12 = vld [vmem:[#allocation7 + $0x20] sm:$0xff]  ;;  %v439_v41 = vld [vmem:[#allocation7 + $0x348] sm:$0xff] }
  0x89   : > { %1199 = vmatpush1.bf16.msra.mxu1 %v2418_v28  ;;  %1285 = vmatpush1.bf16.msra.mxu0 %v2422_v45  ;;  %v2487_v11 = vcombine.high %v448_v3, %v456_v4  ;;  %v346_v13 = vld [vmem:[#allocation7 + $0x60] sm:$0xff]  ;;  %v2486_v16 = vcombine.low %v448_v3, %v456_v4  ;;  %v2469_v47 = vcombine.high %v431_v40, %v439_v41  ;;  %v447_v49 = vld [vmem:[#allocation7 + $0x388] sm:$0xff]  ;;  %v345_v58 = vld [vmem:[#allocation7 + $0x58] sm:$0xff] }
  0x8a   : > { %1200 = vmatprep.subr.bf16.mxu1 %v2435_v30  ;;  %1286 = vmatprep.subr.bf16.mxu0 %v2439_v48  ;;  %v2379_v19 = vcombine.high %v338_v12, %v346_v13  ;;  %v354_v20 = vld [vmem:[#allocation7 + $0xa0] sm:$0xff]  ;;  %v2378_v24 = vcombine.low %v338_v12, %v346_v13  ;;  %v2420_v30 = vcombine.low %v383_v17, %v391_v18  ;;  %v455_v50 = vld [vmem:[#allocation7 + $0x3c8] sm:$0xff]  ;;  %v361_v3 = vld [vmem:[#allocation7 + $0xd8] sm:$0xff] }
  0x8b   : > { %v362_v21 = vld [vmem:[#allocation7 + $0xe0] sm:$0xff]  ;;  %v2485_v55 = vcombine.high %v447_v49, %v455_v50  ;;  %v2393_v9 = vcombine.high %v353_v1, %v361_v3  ;;  %v377_v12 = vld [vmem:[#allocation7 + $0x158] sm:$0xff] }
  0x8c   : > { %v2395_v27 = vcombine.high %v354_v20, %v362_v21  ;;  %v370_v28 = vld [vmem:[#allocation7 + $0x120] sm:$0xff]  ;;  %v2394_v34 = vcombine.low %v354_v20, %v362_v21  ;;  %v393_v20 = vld [vmem:[#allocation7 + $0x1d8] sm:$0xff] }
  0x8d   : > { %1201 = vmatpush1.bf16.msra.mxu1 %v2434_v36  ;;  %1287 = vmatpush1.bf16.msra.mxu0 %v2438_v53  ;;  %v378_v29 = vld [vmem:[#allocation7 + $0x160] sm:$0xff] }
  0x8e   : > { %1202 = vmatprep.subr.bf16.mxu1 %v2451_v38  ;;  %1288 = vmatprep.subr.bf16.mxu0 %v2455_v56  ;;  %v2411_v35 = vcombine.high %v370_v28, %v378_v29  ;;  %v386_v36 = vld [vmem:[#allocation7 + $0x1a0] sm:$0xff]  ;;  %v2436_v38 = vcombine.low %v399_v25, %v407_v26  ;;  %v2410_v42 = vcombine.low %v370_v28, %v378_v29  ;;  %v409_v28 = vld [vmem:[#allocation7 + $0x258] sm:$0xff] }
  0x8f   : > { %v394_v37 = vld [vmem:[#allocation7 + $0x1e0] sm:$0xff] }
  0x90   : > { %v2427_v43 = vcombine.high %v386_v36, %v394_v37  ;;  %v410_v45 = vld [vmem:[#allocation7 + $0x260] sm:$0xff]  ;;  %v2426_v48 = vcombine.low %v386_v36, %v394_v37  ;;  %v425_v36 = vld [vmem:[#allocation7 + $0x2d8] sm:$0xff] }
  0x91   : > { %1203 = vmatpush1.bf16.msra.mxu1 %v2450_v44  ;;  %1289 = vmatpush1.bf16.msra.mxu0 %v2454_v61  ;;  %v402_v44 = vld [vmem:[#allocation7 + $0x220] sm:$0xff] }
  0x92   : > { %1204 = vmatprep.subr.bf16.mxu1 %v2467_v46  ;;  %1290 = vmatprep.subr.bf16.mxu0 %v2471_v63  ;;  %v2452_v46 = vcombine.low %v415_v31, %v423_v33  ;;  %v2443_v51 = vcombine.high %v402_v44, %v410_v45  ;;  %v426_v53 = vld [vmem:[#allocation7 + $0x2e0] sm:$0xff]  ;;  %v2442_v56 = vcombine.low %v402_v44, %v410_v45  ;;  %v380_v31 = vld [vmem:[#allocation7 + $0x170] sm:$0xff]  ;;  %v441_v44 = vld [vmem:[#allocation7 + $0x358] sm:$0xff] }
  0x93   : > { %v442_v61 = vld [vmem:[#allocation7 + $0x360] sm:$0xff]  ;;  %v2377_v63 = vcombine.high %v337_v57, %v345_v58 }
  0x95   : > { %1205 = vmatpush1.bf16.msra.mxu1 %v2466_v52  ;;  %1291 = vmatpush1.bf16.msra.mxu0 %v2470_v8  ;;  %v418_v52 = vld [vmem:[#allocation7 + $0x2a0] sm:$0xff]  ;;  %v2376_v8 = vcombine.low %v337_v57, %v345_v58 }
  0x96   : > { %1206 = vmatprep.subr.bf16.mxu1 %v2483_v54  ;;  %1292 = vmatprep.subr.bf16.mxu0 %v2487_v11  ;;  %v2468_v54 = vcombine.low %v431_v40, %v439_v41  ;;  %v2459_v59 = vcombine.high %v418_v52, %v426_v53  ;;  %v2458_v0 = vcombine.low %v418_v52, %v426_v53  ;;  %v369_v11 = vld [vmem:[#allocation7 + $0x118] sm:$0xff] }
  0x97   : > { %v2409_v17 = vcombine.high %v369_v11, %v377_v12  ;;  %v457_v52 = vld [vmem:[#allocation7 + $0x3d8] sm:$0xff] }
  0x99   : > { %1207 = vmatpush1.bf16.msra.mxu1 %v2482_v60  ;;  %1293 = vmatpush1.bf16.msra.mxu0 %v2486_v16  ;;  %v434_v60 = vld [vmem:[#allocation7 + $0x320] sm:$0xff]  ;;  %v2392_v16 = vcombine.low %v353_v1, %v361_v3 }
  0x9a   : > { %1235 = vmatprep.subr.bf16.mxu1 %v2373_v62  ;;  %1364 = vmatprep.subr.bf16.mxu0 %v2379_v19  ;;  %v2484_v62 = vcombine.low %v447_v49, %v455_v50  ;;  %v2475_v4 = vcombine.high %v434_v60, %v442_v61  ;;  %v2474_v10 = vcombine.low %v434_v60, %v442_v61  ;;  %v385_v19 = vld [vmem:[#allocation7 + $0x198] sm:$0xff]  ;;  %v347_v60 = vld [vmem:[#allocation7 + $0x68] sm:$0xff] }
  0x9b   : > { %v2425_v25 = vcombine.high %v385_v19, %v393_v20 }
  0x9c   : > { %1225 = vmatmul.mubr.bf16.vlgmr.msra.gmra.mrb[0].mxu1 %v3283_v2  ;;  %1311 = vmatmul.mubr.bf16.vlgmr.msra.gmra.mrb[0].mxu0 %v3283_v2 }
  0x9d   : > { %1236 = vmatpush1.bf16.msra.mxu1 %v2372_v5  ;;  %1267 = vmatprep.mubr.bf16.mxu1 %v3026_v7  ;;  %v450_v5 = vld [vmem:[#allocation7 + $0x3a0] sm:$0xff] }
  0x9e   : > { %1237 = vmatprep.subr.bf16.mxu1 %v2389_v6  ;;  %1365 = vmatpush1.bf16.msra.mxu0 %v2378_v24  ;;  %v458_v6 = vld [vmem:[#allocation7 + $0x3e0] sm:$0xff]  ;;  %v2408_v24 = vcombine.low %v369_v11, %v377_v12 }
  0x9f   : > { %1366 = vmatprep.subr.bf16.mxu0 %v2395_v27  ;;  %1396 = vmatprep.mubr.bf16.mxu0 %v3026_v7  ;;  %v2491_v13 = vcombine.high %v450_v5, %v458_v6  ;;  %v2490_v18 = vcombine.low %v450_v5, %v458_v6  ;;  %v401_v27 = vld [vmem:[#allocation7 + $0x218] sm:$0xff]  ;;  %v363_v5 = vld [vmem:[#allocation7 + $0xe8] sm:$0xff] }
  0xa0   : > { %v2441_v33 = vcombine.high %v401_v27, %v409_v28  ;;  %v2440_v40 = vcombine.low %v401_v27, %v409_v28 }
  0xa1   : > { %1238 = vmatpush1.bf16.msra.mxu1 %v2388_v14  ;;  %v340_v14 = vld [vmem:[#allocation7 + $0x30] sm:$0xff] }
  0xa2   : > { %1239 = vmatprep.subr.bf16.mxu1 %v2405_v15  ;;  %1367 = vmatpush1.bf16.msra.mxu0 %v2394_v34  ;;  %v348_v15 = vld [vmem:[#allocation7 + $0x70] sm:$0xff] }
  0xa3   : > { %1368 = vmatprep.subr.bf16.mxu0 %v2411_v35  ;;  %v2383_v21 = vcombine.high %v340_v14, %v348_v15  ;;  %v2382_v26 = vcombine.low %v340_v14, %v348_v15  ;;  %v417_v35 = vld [vmem:[#allocation7 + $0x298] sm:$0xff]  ;;  %v379_v14 = vld [vmem:[#allocation7 + $0x168] sm:$0xff] }
  0xa4   : > { %v2457_v41 = vcombine.high %v417_v35, %v425_v36 }
  0xa5   : > { %1240 = vmatpush1.bf16.msra.mxu1 %v2404_v22  ;;  %v356_v22 = vld [vmem:[#allocation7 + $0xb0] sm:$0xff] }
  0xa6   : > { %1241 = vmatprep.subr.bf16.mxu1 %v2421_v23  ;;  %1369 = vmatpush1.bf16.msra.mxu0 %v2410_v42  ;;  %v364_v23 = vld [vmem:[#allocation7 + $0xf0] sm:$0xff] }
  0xa7   : > { %1370 = vmatprep.subr.bf16.mxu0 %v2427_v43  ;;  %v2399_v29 = vcombine.high %v356_v22, %v364_v23  ;;  %v2398_v34 = vcombine.low %v356_v22, %v364_v23  ;;  %v433_v43 = vld [vmem:[#allocation7 + $0x318] sm:$0xff] }
  0xa8   : > { %v2473_v49 = vcombine.high %v433_v43, %v441_v44 }
  0xa9   : > { %1242 = vmatpush1.bf16.msra.mxu1 %v2420_v30  ;;  %v372_v30 = vld [vmem:[#allocation7 + $0x130] sm:$0xff] }
  0xaa   : > { %1243 = vmatprep.subr.bf16.mxu1 %v2437_v32  ;;  %1371 = vmatpush1.bf16.msra.mxu0 %v2426_v48  ;;  %v2424_v32 = vcombine.low %v385_v19, %v393_v20  ;;  %v2415_v37 = vcombine.high %v372_v30, %v380_v31  ;;  %v2414_v42 = vcombine.low %v372_v30, %v380_v31  ;;  %v387_v19 = vld [vmem:[#allocation7 + $0x1a8] sm:$0xff]  ;;  %v2827_v31 = vld [vmem:[%s3595_s4 + $0x10] sm:$0xff]  }
  0xab   : > { %1372 = vmatprep.subr.bf16.mxu0 %v2443_v51  ;;  %v2456_v48 = vcombine.low %v417_v35, %v425_v36  ;;  %v449_v51 = vld [vmem:[#allocation7 + $0x398] sm:$0xff]  ;;  %v395_v20 = vld [vmem:[#allocation7 + $0x1e8] sm:$0xff] }
  0xac   : > { %v2489_v57 = vcombine.high %v449_v51, %v457_v52  ;;  %v2429_v23 = vcombine.high %v387_v19, %v395_v20  ;;  %v2428_v27 = vcombine.low %v387_v19, %v395_v20  ;;  %v427_v30 = vld [vmem:[#allocation7 + $0x2e8] sm:$0xff]  ;;  %v2828_v36 = vld [vmem:[%s3595_s4 + $0x18] sm:$0xff]   ;;  %v3330_v19 = vstv %s2507_s9 }
  0xad   : > { %1244 = vmatpush1.bf16.msra.mxu1 %v2436_v38  ;;  %v388_v38 = vld [vmem:[#allocation7 + $0x1b0] sm:$0xff]  ;;  %v443_v35 = vld [vmem:[#allocation7 + $0x368] sm:$0xff]  ;;  %v1882_v20 = vadd.s32 1, %v3330_v19 }
  0xae   : > { %1245 = vmatprep.subr.bf16.mxu1 %v2453_v39  ;;  %1373 = vmatpush1.bf16.msra.mxu0 %v2442_v56  ;;  %v396_v39 = vld [vmem:[#allocation7 + $0x1f0] sm:$0xff]  ;;  %v2472_v56 = vcombine.low %v433_v43, %v441_v44  ;;  %v341_v44 = vld [vmem:[#allocation7 + $0x38] sm:$0xff] }
  0xaf   : > { %1374 = vmatprep.subr.bf16.mxu0 %v2459_v59  ;;  %v2431_v45 = vcombine.high %v388_v38, %v396_v39  ;;  %v2430_v50 = vcombine.low %v388_v38, %v396_v39  ;;  %v339_v59 = vld [vmem:[#allocation7 + $0x28] sm:$0xff] }
  0xb0   : > { %v2381_v1 = vcombine.high %v339_v59, %v347_v60  ;;  %v451_v39 = vld [vmem:[#allocation7 + $0x3a8] sm:$0xff] }
  0xb1   : > { %1246 = vmatpush1.bf16.msra.mxu1 %v2452_v46  ;;  %v404_v46 = vld [vmem:[#allocation7 + $0x230] sm:$0xff] }
  0xb2   : > { %1247 = vmatprep.subr.bf16.mxu1 %v2469_v47  ;;  %1375 = vmatpush1.bf16.msra.mxu0 %v2458_v0  ;;  %v412_v47 = vld [vmem:[#allocation7 + $0x270] sm:$0xff]  ;;  %v2488_v0 = vcombine.low %v449_v51, %v457_v52 }
  0xb3   : > { %1376 = vmatprep.subr.bf16.mxu0 %v2475_v4  ;;  %v2447_v53 = vcombine.high %v404_v46, %v412_v47  ;;  %v2446_v58 = vcombine.low %v404_v46, %v412_v47  ;;  %v355_v4 = vld [vmem:[#allocation7 + $0xa8] sm:$0xff]  ;;  %v2831_v51 = vld [vmem:[%s3595_s4 + $0x30] sm:$0xff]  }
  0xb4   : > { %v2397_v11 = vcombine.high %v355_v4, %v363_v5  ;;  %v2830_v46 = vld [vmem:[%s3595_s4 + $0x28] sm:$0xff]  }
  0xb5   : > { %1248 = vmatpush1.bf16.msra.mxu1 %v2468_v54  ;;  %v420_v54 = vld [vmem:[#allocation7 + $0x2b0] sm:$0xff] }
  0xb6   : > { %1249 = vmatprep.subr.bf16.mxu1 %v2485_v55  ;;  %1377 = vmatpush1.bf16.msra.mxu0 %v2474_v10  ;;  %v428_v55 = vld [vmem:[#allocation7 + $0x2f0] sm:$0xff]  ;;  %v2380_v10 = vcombine.low %v339_v59, %v347_v60  ;;  %v389_v59 = vld [vmem:[#allocation7 + $0x1b8] sm:$0xff] }
  0xb7   : > { %1378 = vmatprep.subr.bf16.mxu0 %v2491_v13  ;;  %v2463_v61 = vcombine.high %v420_v54, %v428_v55  ;;  %v2462_v3 = vcombine.low %v420_v54, %v428_v55  ;;  %v371_v13 = vld [vmem:[#allocation7 + $0x128] sm:$0xff]  ;;  %v373_v54 = vld [vmem:[#allocation7 + $0x138] sm:$0xff] }
  0xb8   : > { %v2412_v22 = vcombine.low %v371_v13, %v379_v14  ;;  %v381_v55 = vld [vmem:[#allocation7 + $0x178] sm:$0xff] }
  0xb9   : > { %1250 = vmatpush1.bf16.msra.mxu1 %v2484_v62  ;;  %v436_v62 = vld [vmem:[#allocation7 + $0x330] sm:$0xff]  ;;  %v397_v60 = vld [vmem:[#allocation7 + $0x1f8] sm:$0xff] }
  0xba   : > { %1321 = vmatprep.subr.bf16.mxu1 %v2377_v63  ;;  %1379 = vmatpush1.bf16.msra.mxu0 %v2490_v18  ;;  %v444_v63 = vld [vmem:[#allocation7 + $0x370] sm:$0xff] }
  0xbb   : > { %1450 = vmatprep.subr.bf16.mxu0 %v2383_v21  ;;  %v2479_v6 = vcombine.high %v436_v62, %v444_v63  ;;  %v2478_v12 = vcombine.low %v436_v62, %v444_v63  ;;  %v2825_v21 = vld [vmem:[%s3595_s4] sm:$0xff]   ;;  %v2433_v62 = vcombine.high %v389_v59, %v397_v60  ;;  %v405_v63 = vld [vmem:[#allocation7 + $0x238] sm:$0xff] }
  0xbc   : > { %1268 = vmatmul.mubr.bf16.vlgmr.msra.gmra.mrb[4].mxu1 %v3283_v2 }
  0xbd   : > { %1322 = vmatpush1.bf16.msra.mxu1 %v2376_v8  ;;  %1353 = vmatprep.mubr.bf16.mxu1 %v3026_v7  ;;  %v452_v8 = vld [vmem:[#allocation7 + $0x3b0] sm:$0xff] }
  0xbe   : > { %1323 = vmatprep.subr.bf16.mxu1 %v2393_v9  ;;  %1397 = vmatmul.mubr.bf16.vlgmr.msra.gmra.mrb[4].mxu0 %v3283_v2  ;;  %v460_v9 = vld [vmem:[#allocation7 + $0x3f0] sm:$0xff] }
  0xbf   : > { %1451 = vmatpush1.bf16.msra.mxu0 %v2382_v26  ;;  %1482 = vmatprep.mubr.bf16.mxu0 %v3026_v7  ;;  %v2495_v15 = vcombine.high %v452_v8, %v460_v9  ;;  %v2494_v18 = vcombine.low %v452_v8, %v460_v9  ;;  %v2826_v26 = vld [vmem:[%s3595_s4 + $0x8] sm:$0xff]   ;;  %v437_v8 = vld [vmem:[#allocation7 + $0x338] sm:$0xff] }
  0xc0   : > { %1452 = vmatprep.subr.bf16.mxu0 %v2399_v29  ;;  %v419_v29 = vld [vmem:[#allocation7 + $0x2a8] sm:$0xff]  ;;  %v445_v9 = vld [vmem:[#allocation7 + $0x378] sm:$0xff] }
  0xc1   : > { %1324 = vmatpush1.bf16.msra.mxu1 %v2392_v16  ;;  %v2396_v16 = vcombine.low %v355_v4, %v363_v5  ;;  %v421_v4 = vld [vmem:[#allocation7 + $0x2b8] sm:$0xff] }
  0xc2   : > { %1325 = vmatprep.subr.bf16.mxu1 %v2409_v17  ;;  %v2413_v17 = vcombine.high %v371_v13, %v379_v14  ;;  %v429_v5 = vld [vmem:[#allocation7 + $0x2f8] sm:$0xff]  ;;  %v2480_v14 = vcombine.low %v437_v8, %v445_v9 }
  0xc3   : > { %1453 = vmatpush1.bf16.msra.mxu0 %v2398_v34  ;;  %v435_v34 = vld [vmem:[#allocation7 + $0x328] sm:$0xff]  ;;  %v461_v13 = vld [vmem:[#allocation7 + $0x3f8] sm:$0xff] }
  0xc4   : > { %1454 = vmatprep.subr.bf16.mxu0 %v2415_v37  ;;  %v2460_v37 = vcombine.low %v419_v29, %v427_v30  ;;  %v2477_v38 = vcombine.high %v435_v34, %v443_v35 }
  0xc5   : > { %1326 = vmatpush1.bf16.msra.mxu1 %v2408_v24  ;;  %v403_v24 = vld [vmem:[#allocation7 + $0x228] sm:$0xff] }
  0xc6   : > { %1327 = vmatprep.subr.bf16.mxu1 %v2425_v25  ;;  %v411_v25 = vld [vmem:[#allocation7 + $0x268] sm:$0xff] }
  0xc7   : > { %1455 = vmatpush1.bf16.msra.mxu0 %v2414_v42  ;;  %v2445_v28 = vcombine.high %v403_v24, %v411_v25  ;;  %v2476_v42 = vcombine.low %v435_v34, %v443_v35 }
  0xc8   : > { %1456 = vmatprep.subr.bf16.mxu0 %v2431_v45  ;;  %v349_v45 = vld [vmem:[#allocation7 + $0x78] sm:$0xff] }
  0xc9   : > { %1328 = vmatpush1.bf16.msra.mxu1 %v2424_v32  ;;  %v2444_v32 = vcombine.low %v403_v24, %v411_v25  ;;  %v2384_v52 = vcombine.low %v341_v44, %v349_v45 }
  0xca   : > { %1329 = vmatprep.subr.bf16.mxu1 %v2441_v33  ;;  %v2461_v33 = vcombine.high %v419_v29, %v427_v30  ;;  %v1884_v29 = vadd.s32 3, %v3330_v19 }
  0xcb   : > { %1457 = vmatpush1.bf16.msra.mxu0 %v2430_v50  ;;  %v365_v50 = vld [vmem:[#allocation7 + $0xf8] sm:$0xff] }
  0xcc   : > { %1458 = vmatprep.subr.bf16.mxu0 %v2447_v53 }
  0xcd   : > { %1330 = vmatpush1.bf16.msra.mxu1 %v2440_v40  ;;  %v459_v40 = vld [vmem:[#allocation7 + $0x3e8] sm:$0xff] }
  0xce   : > { %1331 = vmatprep.subr.bf16.mxu1 %v2457_v41  ;;  %v2829_v41 = vld [vmem:[%s3595_s4 + $0x20] sm:$0xff]   ;;  %v2493_v43 = vcombine.high %v451_v39, %v459_v40  ;;  %v2492_v47 = vcombine.low %v451_v39, %v459_v40 }
  0xcf   : > { %1459 = vmatpush1.bf16.msra.mxu0 %v2446_v58  ;;  %v2417_v58 = vcombine.high %v373_v54, %v381_v55 }
  0xd0   : > { %1460 = vmatprep.subr.bf16.mxu0 %v2463_v61  ;;  %v2416_v61 = vcombine.low %v373_v54, %v381_v55  ;;  %v1885_v54 = vadd.s32 4, %v3330_v19 }
  0xd1   : > { %1332 = vmatpush1.bf16.msra.mxu1 %v2456_v48  ;;  %v2385_v48 = vcombine.high %v341_v44, %v349_v45 }
  0xd2   : > { %1333 = vmatprep.subr.bf16.mxu1 %v2473_v49  ;;  %v357_v49 = vld [vmem:[#allocation7 + $0xb8] sm:$0xff] }
  0xd3   : > { %1461 = vmatpush1.bf16.msra.mxu0 %v2462_v3  ;;  %v2401_v53 = vcombine.high %v357_v49, %v365_v50 }
  0xd4   : > { %1462 = vmatprep.subr.bf16.mxu0 %v2479_v6  ;;  %v2465_v6 = vcombine.high %v421_v4, %v429_v5 }
  0xd5   : > { %1334 = vmatpush1.bf16.msra.mxu1 %v2472_v56  ;;  %v2832_v56 = vld [vmem:[%s3595_s4 + $0x38] sm:$0xff]  }
  0xd6   : > { %1335 = vmatprep.subr.bf16.mxu1 %v2489_v57  ;;  %v2400_v57 = vcombine.low %v357_v49, %v365_v50  ;;  %v1886_v49 = vadd.s32 5, %v3330_v19 }
  0xd7   : > { %1463 = vmatpush1.bf16.msra.mxu0 %v2478_v12  ;;  %v453_v12 = vld [vmem:[#allocation7 + $0x3b8] sm:$0xff] }
  0xd8   : > { %1464 = vmatprep.subr.bf16.mxu0 %v2495_v15  ;;  %v2497_v15 = vcombine.high %v453_v12, %v461_v13 }
  0xd9   : > { %1336 = vmatpush1.bf16.msra.mxu1 %v2488_v0  ;;  %v413_v0 = vld [vmem:[#allocation7 + $0x278] sm:$0xff] }
  0xda   : > { %1407 = vmatprep.subr.bf16.mxu1 %v2381_v1  ;;  %v2432_v1 = vcombine.low %v389_v59, %v397_v60  ;;  %v2449_v3 = vcombine.high %v405_v63, %v413_v0 }
  0xdb   : > { %1465 = vmatpush1.bf16.msra.mxu0 %v2494_v18  ;;  %v3328_v18 = vld [vmem:[%s3272_s14 + $0x8] sm:$0xff] }
  0xdc   : > { %1354 = vmatmul.mubr.bf16.vlgmr.msra.gmra.mrb[8].mxu1 %v3283_v2  ;;  %2572 = vmatprep.subr.bf16.mxu0 %v2825_v21  ;;  %vm1900_vm1 = vcmp.lt.s32.totalorder %v3330_v19, %v3328_v18  ;;  %vm1902_vm3 = vcmp.lt.s32.totalorder %v1882_v20, %v3328_v18  ;;  %vm1906_vm7 = vcmp.lt.s32.totalorder %v1884_v29, %v3328_v18 }
  0xdd   : > { %1408 = vmatpush1.bf16.msra.mxu1 %v2380_v10  ;;  %1439 = vmatprep.mubr.bf16.mxu1 %v3026_v7  ;;  %v2464_v10 = vcombine.low %v421_v4, %v429_v5  ;;  %vm1910_vm9 = vcmp.lt.s32.totalorder %v1886_v49, %v3328_v18  ;;  %vm1908_vm11 = vcmp.lt.s32.totalorder %v1885_v54, %v3328_v18 }
  0xde   : > { %1409 = vmatprep.subr.bf16.mxu1 %v2397_v11  ;;  %1483 = vmatmul.mubr.bf16.vlgmr.msra.gmra.mrb[8].mxu0 %v3283_v2  ;;  %v2481_v11 = vcombine.high %v437_v8, %v445_v9  ;;  %v1888_v8 = vadd.s32 7, %v3330_v19  ;;  %v1887_v9 = vadd.s32 6, %v3330_v19 }
  0xdf   : > { %2573 = vmatpush3.bf16.msra.mxu0 %v2825_v21  ;;  %v3027_v21 = vmov 0.0  }
  0xe0   : > { %2574 = vmatprep.subr.bf16.mxu0 %v2826_v26  ;;  %v2511_v25 = vsel %vm1902_vm3, 1.0, %v3027_v21  ;;  %v2515_v34 = vsel %vm1906_vm7, 1.0, %v3027_v21  ;;  %v2519_v59 = vsel %vm1910_vm9, 1.0, %v3027_v21  ;;  %vm1914_vm13 = vcmp.lt.s32.totalorder %v1888_v8, %v3328_v18 }
  0xe1   : > { %1410 = vmatpush1.bf16.msra.mxu1 %v2396_v16  ;;  %v2496_v16 = vcombine.low %v453_v12, %v461_v13  ;;  %v1889_v13 = vadd.s32 8, %v3330_v19  ;;  %vm1912_vm15 = vcmp.lt.s32.totalorder %v1887_v9, %v3328_v18 }
  0xe2   : > { %1411 = vmatprep.subr.bf16.mxu1 %v2413_v17  ;;  %v3325_v17 = vld [vmem:[%s3272_s14] sm:$0xff] }
  0xe3   : > { %2575 = vmatpush3.bf16.msra.mxu0 %v2826_v26  ;;  %vm1899_vm0 = vcmp.lt.s32.totalorder %v3330_v19, %v3325_v17  ;;  %vm1901_vm2 = vcmp.lt.s32.totalorder %v1882_v20, %v3325_v17  ;;  %vm1905_vm6 = vcmp.lt.s32.totalorder %v1884_v29, %v3325_v17  ;;  %vm1909_vm8 = vcmp.lt.s32.totalorder %v1886_v49, %v3325_v17 }
  0xe4   : > { %2576 = vmatprep.subr.bf16.mxu0 %v2827_v31  ;;  %v2510_v24 = vsel %vm1901_vm2, 1.0, %v3027_v21  ;;  %vm1907_vm10 = vcmp.lt.s32.totalorder %v1885_v54, %v3325_v17  ;;  %vm1913_vm12 = vcmp.lt.s32.totalorder %v1888_v8, %v3325_v17  ;;  %vm1911_vm14 = vcmp.lt.s32.totalorder %v1887_v9, %v3325_v17 }
  0xe5   : > { %1412 = vmatpush1.bf16.msra.mxu1 %v2412_v22  ;;  %v2508_v22 = vsel %vm1899_vm0, 1.0, %v3027_v21  ;;  %v2748_v26 = vpack.i.bf16 %v2511_v25, %v2510_v24  ;;  %v2522_v24 = vsel %vm1913_vm12, 1.0, %v3027_v21  ;;  %v2523_v25 = vsel %vm1914_vm13, 1.0, %v3027_v21 }
  0xe6   : > { %1413 = vmatprep.subr.bf16.mxu1 %v2429_v23  ;;  %v2520_v29 = vsel %vm1911_vm14, 1.0, %v3027_v21  ;;  %vm1915_vm2 = vcmp.lt.s32.totalorder %v1889_v13, %v3325_v17  ;;  %vm1916_vm3 = vcmp.lt.s32.totalorder %v1889_v13, %v3328_v18  ;;  %v1894_v49 = vadd.s32 13, %v3330_v19  ;;  %v3451_v13 = vld [vmem:[%s3594_s3 + $0x8] sm:$0xff] }
  0xe7   : > { %2577 = vmatpush3.bf16.msra.mxu0 %v2827_v31 }
  0xe8   : > { %2578 = vmatprep.subr.bf16.mxu0 %v2828_v36  ;;  %vm1926_vm9 = vcmp.lt.s32.totalorder %v1894_v49, %v3328_v18 }
  0xe9   : > { %1414 = vmatpush1.bf16.msra.mxu1 %v2428_v27  ;;  %v466_v27 = vlaneseq }
  0xea   : > { %1415 = vmatprep.subr.bf16.mxu1 %v2445_v28  ;;  %v1883_v28 = vadd.s32 2, %v3330_v19 }
  0xeb   : > { %2579 = vmatpush3.bf16.msra.mxu0 %v2828_v36  ;;  %v3345_v30 = vshrl.u32 %v466_v27, 7  ;;  %v2779_v27 = vpack.i.bf16 %v2523_v25, %v2522_v24 }
  0xec   : > { %2580 = vmatprep.subr.bf16.mxu0 %v2829_v41  ;;  %vm1903_vm4 = vcmp.lt.s32.totalorder %v1883_v28, %v3325_v17  ;;  %vm1904_vm5 = vcmp.lt.s32.totalorder %v1883_v28, %v3328_v18 }
  0xed   : > { %1416 = vmatpush1.bf16.msra.mxu1 %v2444_v32  ;;  %v2512_v31 = vsel %vm1903_vm4, 1.0, %v3027_v21  ;;  %v2513_v32 = vsel %vm1904_vm5, 1.0, %v3027_v21  ;;  %v472_v39 = vsub.s32 1, %v3345_v30 }
  0xee   : > { %1417 = vmatprep.subr.bf16.mxu1 %v2461_v33  ;;  %v2514_v33 = vsel %vm1905_vm6, 1.0, %v3027_v21  ;;  %v2754_v35 = vpack.i.bf16 %v2513_v32, %v2512_v31  ;;  %v2521_v31 = vsel %vm1912_vm15, 1.0, %v3027_v21 }
  0xef   : > { %2581 = vmatpush3.bf16.msra.mxu0 %v2829_v41  ;;  %v2759_v36 = vpack.i.bf16 %v2515_v34, %v2514_v33  ;;  %v2774_v33 = vpack.i.bf16 %v2521_v31, %v2520_v29 }
  0xf0   : > { %2582 = vmatprep.subr.bf16.mxu0 %v2830_v46  ;;  %2755 = vperm.xlu1 %2753, %v2754_v35  }
  0xf1   : > { %1418 = vmatpush1.bf16.msra.mxu1 %v2460_v37  ;;  %v468_v37 = vsub.s32 0, %v3345_v30 }
  0xf2   : > { %1419 = vmatprep.subr.bf16.mxu1 %v2477_v38  ;;  %v3359_v38 = vld [vmem:[%s3594_s3] sm:$0xff] }
  0xf3   : > { %2583 = vmatpush3.bf16.msra.mxu0 %v2830_v46  ;;  %v469_v40 = vrot.slane %v3359_v38, %v468_v37  ;;  %v473_v41 = vrot.slane %v3359_v38, %v472_v39 }
  0xf4   : > { %2584 = vmatprep.subr.bf16.mxu0 %v2831_v51  ;;  %2760 = vperm.xlu1 %2753, %v2759_v36  }
  0xf5   : > { %1420 = vmatpush1.bf16.msra.mxu1 %v2476_v42  ;;  %v484_v42 = vsub.s32 4, %v3345_v30 }
  0xf6   : > { %1421 = vmatprep.subr.bf16.mxu1 %v2493_v43 }
  0xf7   : > { %2585 = vmatpush3.bf16.msra.mxu0 %v2831_v51 }
  0xf8   : > { %2586 = vmatprep.subr.bf16.mxu0 %v2832_v56 }
  0xf9   : > { %1422 = vmatpush1.bf16.msra.mxu1 %v2492_v47 }
  0xfa   : > { %1493 = vmatprep.subr.bf16.mxu1 %v2385_v48  ;;  %v488_v48 = vsub.s32 5, %v3345_v30 }
  0xfb   : > { %2587 = vmatpush3.bf16.msra.mxu0 %v2832_v56 }
  0xfc   : > { %1440 = vmatmul.mubr.bf16.vlgmr.msra.gmra.mrb[12].mxu1 %v3283_v2 }
  0xfd   : > { %1494 = vmatpush1.bf16.msra.mxu1 %v2384_v52  ;;  %1525 = vmatprep.mubr.bf16.mxu1 %v3026_v7  ;;  %v2448_v7 = vcombine.low %v405_v63, %v413_v0  ;;  %v489_v0 = vrot.slane %v3359_v38, %v488_v48 }
  0xfe   : > { %1495 = vmatprep.subr.bf16.mxu1 %v2401_v53  ;;  %v485_v53 = vrot.slane %v3359_v38, %v484_v42 }
 0x101   : > { %1496 = vmatpush1.bf16.msra.mxu1 %v2400_v57 }
 0x102   : > { %1497 = vmatprep.subr.bf16.mxu1 %v2417_v58  ;;  %v2518_v58 = vsel %vm1909_vm8, 1.0, %v3027_v21  ;;  %vm1925_vm8 = vcmp.lt.s32.totalorder %v1894_v49, %v3325_v17 }
 0x105   : > { %1498 = vmatpush1.bf16.msra.mxu1 %v2416_v61  ;;  %v2769_v61 = vpack.i.bf16 %v2519_v59, %v2518_v58 }
 0x106   : > { %1499 = vmatprep.subr.bf16.mxu1 %v2433_v62  ;;  %v2516_v62 = vsel %vm1907_vm10, 1.0, %v3027_v21 }
 0x107   : > { %2770 = vperm.xlu1 %2753, %v2769_v61   ;;  %v476_v61 = vsub.s32 2, %v3345_v30 }
 0x109   : > { %1500 = vmatpush1.bf16.msra.mxu1 %v2432_v1  ;;  %v2517_v1 = vsel %vm1908_vm11, 1.0, %v3027_v21 }
 0x10a   : > { %1501 = vmatprep.subr.bf16.mxu1 %v2449_v3  ;;  %v2764_v4 = vpack.i.bf16 %v2517_v1, %v2516_v62  ;;  %v480_v62 = vsub.s32 3, %v3345_v30 }
 0x10b   : > { %2780 = vperm.xlu1 %2753, %v2779_v27  }
 0x10d   : > { %1502 = vmatpush1.bf16.msra.mxu1 %v2448_v7 }
 0x10e   : > { %1503 = vmatprep.subr.bf16.mxu1 %v2465_v6 }
 0x111   : > { %1504 = vmatpush1.bf16.msra.mxu1 %v2464_v10  ;;  %v1890_v10 = vadd.s32 9, %v3330_v19 }
 0x112   : > { %1505 = vmatprep.subr.bf16.mxu1 %v2481_v11 }
 0x113   : > { %vm1917_vm0 = vcmp.lt.s32.totalorder %v1890_v10, %v3325_v17 }
 0x114   : > { %v2526_v34 = vsel %vm1917_vm0, 1.0, %v3027_v21 }
 0x115   : > { %1506 = vmatpush1.bf16.msra.mxu1 %v2480_v14  ;;  %v1892_v14 = vadd.s32 11, %v3330_v19 }
 0x116   : > { %1507 = vmatprep.subr.bf16.mxu1 %v2497_v15  ;;  %v1891_v15 = vadd.s32 10, %v3330_v19 }
 0x117   : > { %vm1921_vm4 = vcmp.lt.s32.totalorder %v1892_v14, %v3325_v17  ;;  %vm1922_vm5 = vcmp.lt.s32.totalorder %v1892_v14, %v3328_v18 }
 0x118   : > { %vm1919_vm6 = vcmp.lt.s32.totalorder %v1891_v15, %v3325_v17  ;;  %vm1920_vm7 = vcmp.lt.s32.totalorder %v1891_v15, %v3328_v18 }
 0x119   : > { %1508 = vmatpush1.bf16.msra.mxu1 %v2496_v16 }
 0x11c   : > { %1526 = vmatmul.mubr.bf16.vlgmr.msra.gmra.mrb[16].mxu1 %v3283_v2  ;;  %v2509_v2 = vsel %vm1900_vm1, 1.0, %v3027_v21  ;;  %vm1918_vm1 = vcmp.lt.s32.totalorder %v1890_v10, %v3328_v18 }
 0x11d   : > { %v2743_v23 = vpack.i.bf16 %v2509_v2, %v2508_v22  ;;  %v2527_v36 = vsel %vm1918_vm1, 1.0, %v3027_v21 }
 0x11f   : > { %2744 = vperm.xlu0 %2742, %v2743_v23  }
 0x123   : > { %2749 = vperm.xlu0 %2742, %v2748_v26  }
 0x127   : > { %2765 = vperm.xlu0 %2742, %v2764_v4  }
 0x12b   : > { %2775 = vperm.xlu0 %2742, %v2774_v33  }
 0x16f   : > { %v1226_v43 = vpop.f32.mrb[0].mxu1  ;;  %v1312_v5 = vpop.f32.mrb[0].mxu0 }
 0x170   : > { %v1227_v44 = vadd.f32 %v1226_v43, %v469_v40  ;;  %v1228_v45 = vpop.f32.mrb[1].mxu1  ;;  %v1313_v7 = vadd.f32 %v1312_v5, %v485_v53  ;;  %v1314_v6 = vpop.f32.mrb[1].mxu0  ;;  %v2525_v43 = vsel %vm1916_vm3, 1.0, %v3027_v21  ;;  %v477_v5 = vrot.slane %v3359_v38, %v476_v61 }
 0x171   : > { %v1229_v46 = vadd.f32 %v1228_v45, %v473_v41  ;;  %v1230_v47 = vpop.f32.mrb[2].mxu1  ;;  %v1315_v11 = vadd.f32 %v1314_v6, %v489_v0  ;;  %v1316_v12 = vpop.f32.mrb[2].mxu0  ;;  %v2530_v45 = vsel %vm1921_vm4, 1.0, %v3027_v21 }
 0x172   : > { %v1536_v50 = vmax.f32 %v1227_v44, 0.0  ;;  %v1231_v51 = vadd.f32 %v1230_v47, %v469_v40  ;;  %v1232_v52 = vpop.f32.mrb[3].mxu1  ;;  %v1540_v16 = vmax.f32 %v1313_v7, 0.0  ;;  %v1317_v20 = vadd.f32 %v1316_v12, %v485_v53  ;;  %v1318_v22 = vpop.f32.mrb[3].mxu0 }
 0x173   : > { %v1537_v55 = vmax.f32 %v1229_v46, 0.0  ;;  %v1233_v56 = vadd.f32 %v1232_v52, %v473_v41  ;;  %v1541_v2 = vmax.f32 %v1315_v11, 0.0  ;;  %v1319_v23 = vadd.f32 %v1318_v22, %v489_v0 }
 0x174   : > { %v1552_v57 = vmax.f32 %v1231_v51, 0.0  ;;  %v1556_v26 = vmax.f32 %v1317_v20, 0.0  ;;  %v2789_v40 = vpack.i.bf16 %v2527_v36, %v2526_v34  ;;  %v2524_v41 = vsel %vm1915_vm2, 1.0, %v3027_v21 }
 0x175   : > { %v1553_v60 = vmax.f32 %v1233_v56, 0.0  ;;  %v1557_v28 = vmax.f32 %v1319_v23, 0.0  ;;  %v2784_v44 = vpack.i.bf16 %v2525_v43, %v2524_v41  ;;  %v2531_v46 = vsel %vm1922_vm5, 1.0, %v3027_v21 }
 0x176   : > { %v1568_v63 = vpack.c.bf16 %v1552_v57, %v1536_v50  ;;  %v3401_v32 = vpack.c.bf16 %v1556_v26, %v1540_v16  ;;  %2790 = vperm.xlu1 %2753, %v2789_v40   ;;  %v2528_v47 = vsel %vm1919_vm6, 1.0, %v3027_v21  ;;  %v2799_v50 = vpack.i.bf16 %v2531_v46, %v2530_v45 }
 0x177   : > { %v1569_v3 = vpack.c.bf16 %v1553_v60, %v1537_v55  ;;  %v3405_v35 = vpack.c.bf16 %v1557_v28, %v1541_v2  ;;  %v2529_v51 = vsel %vm1920_vm7, 1.0, %v3027_v21  ;;  %v1893_v52 = vadd.s32 12, %v3330_v19  ;;  %2785 = vperm.xlu0 %2742, %v2784_v44  }
 0x178   : > { %2588 = vmatprep.mubr.bf16.mxu0 %v1568_v63  ;;  %v1896_v53 = vadd.s32 15, %v3330_v19  ;;  %v2794_v54 = vpack.i.bf16 %v2529_v51, %v2528_v47  ;;  %v1895_v55 = vadd.s32 14, %v3330_v19  ;;  %v2534_v56 = vsel %vm1925_vm8, 1.0, %v3027_v21 }
 0x179   : > { %2589 = vmatmul.mubr.bf16.vlgmr.msra.gmra.mrb[12].mxu0 %v1569_v3  ;;  %v2535_v57 = vsel %vm1926_vm9, 1.0, %v3027_v21  ;;  %vm1923_vm10 = vcmp.lt.s32.totalorder %v1893_v52, %v3325_v17  ;;  %vm1924_vm11 = vcmp.lt.s32.totalorder %v1893_v52, %v3328_v18  ;;  %v501_v22 = vrot.slane %v3451_v13, %v468_v37 }
 0x17a   : > { %2800 = vperm.xlu1 %2753, %v2799_v50   ;;  %v2809_v58 = vpack.i.bf16 %v2535_v57, %v2534_v56  ;;  %v2532_v59 = vsel %vm1923_vm10, 1.0, %v3027_v21  ;;  %v2533_v60 = vsel %vm1924_vm11, 1.0, %v3027_v21  ;;  %vm1929_vm12 = vcmp.lt.s32.totalorder %v1896_v53, %v3325_v17 }
 0x17b   : > { %vm1930_vm13 = vcmp.lt.s32.totalorder %v1896_v53, %v3328_v18  ;;  %v2538_v19 = vsel %vm1929_vm12, 1.0, %v3027_v21  ;;  %vm1927_vm14 = vcmp.lt.s32.totalorder %v1895_v55, %v3325_v17  ;;  %2795 = vperm.xlu0 %2742, %v2794_v54   ;;  %v2804_v63 = vpack.i.bf16 %v2533_v60, %v2532_v59 }
 0x17c   : > { %v2539_v0 = vsel %vm1930_vm13, 1.0, %v3027_v21  ;;  %vm1928_vm15 = vcmp.lt.s32.totalorder %v1895_v55, %v3328_v18  ;;  %v2536_v1 = vsel %vm1927_vm14, 1.0, %v3027_v21  ;;  %v481_v17 = vrot.slane %v3359_v38, %v480_v62 }
 0x17d   : > { %v2537_v3 = vsel %vm1928_vm15, 1.0, %v3027_v21  ;;  %v2819_v4 = vpack.i.bf16 %v2539_v0, %v2538_v19  ;;  %v505_v23 = vrot.slane %v3451_v13, %v472_v39  ;;  %v492_v39 = vsub.s32 6, %v3345_v30 }
 0x17e   : > { %2810 = vperm.xlu1 %2753, %v2809_v58   ;;  %v2814_v7 = vpack.i.bf16 %v2537_v3, %v2536_v1  ;;  %v496_v45 = vsub.s32 7, %v3345_v30  ;;  %v517_v59 = vrot.slane %v3451_v13, %v484_v42 }
 0x17f   : > { %2805 = vperm.xlu0 %2742, %v2804_v63   ;;  %v493_v46 = vrot.slane %v3359_v38, %v492_v39  ;;  %v525_v30 = vrot.slane %v3451_v13, %v492_v39 }
 0x182   : > { %2820 = vperm.xlu1 %2753, %v2819_v4  }
 0x183   : > { %2815 = vperm.xlu0 %2742, %v2814_v7  }
 0x18f   : > { %v1269_v6 = vpop.f32.mrb[4].mxu1 }
 0x190   : > { %v1270_v8 = vadd.f32 %v1269_v6, %v477_v5  ;;  %v1271_v18 = vpop.f32.mrb[5].mxu1 }
 0x191   : > { %v1272_v9 = vadd.f32 %v1271_v18, %v481_v17  ;;  %v1273_v10 = vpop.f32.mrb[6].mxu1  ;;  %v1398_v25 = vpop.f32.mrb[4].mxu0 }
 0x192   : > { %v1538_v21 = vmax.f32 %v1270_v8, 0.0  ;;  %v1274_v11 = vadd.f32 %v1273_v10, %v477_v5  ;;  %v1275_v12 = vpop.f32.mrb[7].mxu1  ;;  %v1399_v26 = vadd.f32 %v1398_v25, %v501_v22  ;;  %v1400_v27 = vpop.f32.mrb[5].mxu0 }
 0x193   : > { %v1276_v14 = vadd.f32 %v1275_v12, %v481_v17  ;;  %v1539_v16 = vmax.f32 %v1272_v9, 0.0  ;;  %v1401_v28 = vadd.f32 %v1400_v27, %v505_v23  ;;  %v1402_v29 = vpop.f32.mrb[6].mxu0 }
 0x194   : > { %v1554_v15 = vmax.f32 %v1274_v11, 0.0  ;;  %v1544_v31 = vmax.f32 %v1399_v26, 0.0  ;;  %v1403_v33 = vadd.f32 %v1402_v29, %v501_v22  ;;  %v1404_v34 = vpop.f32.mrb[7].mxu0 }
 0x195   : > { %v1555_v20 = vmax.f32 %v1276_v14, 0.0  ;;  %v1545_v36 = vmax.f32 %v1401_v28, 0.0  ;;  %v1405_v37 = vadd.f32 %v1404_v34, %v505_v23 }
 0x196   : > { %v1570_v2 = vpack.c.bf16 %v1554_v15, %v1538_v21  ;;  %v1560_v40 = vmax.f32 %v1403_v33, 0.0  ;;  %v513_v21 = vrot.slane %v3451_v13, %v480_v62 }
 0x197   : > { %v1571_v24 = vpack.c.bf16 %v1555_v20, %v1539_v16  ;;  %v1561_v41 = vmax.f32 %v1405_v37, 0.0 }
 0x198   : > { %2592 = vmatprep.mubr.bf16.mxu0 %v1570_v2  ;;  %v1576_v43 = vpack.c.bf16 %v1560_v40, %v1544_v31 }
 0x199   : > { %2593 = vmatmul.mubr.bf16.gmra.mrb[16].mxu0 %v1571_v24  ;;  %v1577_v44 = vpack.c.bf16 %v1561_v41, %v1545_v36 }
 0x19a   : > { %2596 = vmatprep.mubr.bf16.mxu0 %v3401_v32  ;;  %v497_v32 = vrot.slane %v3359_v38, %v496_v45  ;;  %v521_v38 = vrot.slane %v3451_v13, %v488_v48  ;;  %v509_v48 = vrot.slane %v3451_v13, %v476_v61  ;;  %v529_v61 = vrot.slane %v3451_v13, %v496_v45 }
 0x19e   : > { %v2745_v45 = vpop.permute.xlu0 %2744 }
 0x1a1   : > { %2597 = vmatmul.mubr.bf16.gmra.mrb[20].mxu0 %v3405_v35 }
 0x1af   : > { %v1355_v47 = vpop.f32.mrb[8].mxu1 }
 0x1b0   : > { %v1356_v49 = vadd.f32 %v1355_v47, %v493_v46  ;;  %v1357_v50 = vpop.f32.mrb[9].mxu1 }
 0x1b1   : > { %v1358_v51 = vadd.f32 %v1357_v50, %v497_v32  ;;  %v1359_v52 = vpop.f32.mrb[10].mxu1  ;;  %v1484_v63 = vpop.f32.mrb[8].mxu0 }
 0x1b2   : > { %v1542_v53 = vmax.f32 %v1356_v49, 0.0  ;;  %v1360_v54 = vadd.f32 %v1359_v52, %v493_v46  ;;  %v1361_v55 = vpop.f32.mrb[11].mxu1  ;;  %v1485_v0 = vadd.f32 %v1484_v63, %v517_v59  ;;  %v1486_v1 = vpop.f32.mrb[9].mxu0  ;;  %v3482_v52 = vld [vmem:[%s3596_s5] ss:$0 sm:$0xff] }
 0x1b3   : > { %v1362_v56 = vadd.f32 %v1361_v55, %v497_v32  ;;  %v1543_v58 = vmax.f32 %v1358_v51, 0.0  ;;  %v1487_v3 = vadd.f32 %v1486_v1, %v521_v38  ;;  %v1488_v4 = vpop.f32.mrb[10].mxu0  ;;  %v2756_v51 = vpop.permute.xlu1 %2755 }
 0x1b4   : > { %v1558_v57 = vmax.f32 %v1360_v54, 0.0  ;;  %v1548_v5 = vmax.f32 %v1485_v0, 0.0  ;;  %v1489_v17 = vadd.f32 %v1488_v4, %v517_v59  ;;  %v1490_v7 = vpop.f32.mrb[11].mxu0  ;;  %v2750_v55 = vpop.permute.xlu0 %2749 }
 0x1b5   : > { %v1559_v35 = vmax.f32 %v1362_v56, 0.0  ;;  %v1549_v6 = vmax.f32 %v1487_v3, 0.0  ;;  %v1491_v8 = vadd.f32 %v1490_v7, %v521_v38  ;;  %v2752_v4 = vunpack.i.h.bf16 %v2750_v55 }
 0x1b6   : > { %v1574_v60 = vpack.c.bf16 %v1558_v57, %v1542_v53  ;;  %v1564_v42 = vmax.f32 %v1489_v17, 0.0 }
 0x1b7   : > { %v1575_v19 = vpack.c.bf16 %v1559_v35, %v1543_v58  ;;  %v1565_v18 = vmax.f32 %v1491_v8, 0.0  ;;  %v2761_v56 = vpop.permute.xlu1 %2760  ;;  %v2747_v58 = vunpack.i.h.bf16 %v2745_v45  ;;  %v2746_v35 = vunpack.i.l.bf16 %v2745_v45 }
 0x1b8   : > { %2600 = vmatprep.mubr.bf16.mxu0 %v1574_v60  ;;  %v1580_v9 = vpack.c.bf16 %v1564_v42, %v1548_v5  ;;  %v2762_v1 = vunpack.i.l.bf16 %v2761_v56  ;;  %v2757_v5 = vunpack.i.l.bf16 %v2756_v51  ;;  %v2763_v42 = vunpack.i.h.bf16 %v2761_v56 }
 0x1b9   : > { %2601 = vmatmul.mubr.bf16.gmra.mrb[24].mxu0 %v1575_v19  ;;  %v1581_v10 = vpack.c.bf16 %v1565_v18, %v1549_v6  ;;  %v2751_v19 = vunpack.i.l.bf16 %v2750_v55 }
 0x1ba   : > { %2604 = vmatprep.mubr.bf16.mxu0 %v1576_v43 }
 0x1c1   : > { %2605 = vmatmul.mubr.bf16.gmra.mrb[28].mxu0 %v1577_v44 }
 0x1cf   : > { %v1441_v11 = vpop.f32.mrb[12].mxu1 }
 0x1d0   : > { %v1442_v12 = vadd.f32 %v1441_v11, %v509_v48  ;;  %v1443_v14 = vpop.f32.mrb[13].mxu1 }
 0x1d1   : > { %v1444_v15 = vadd.f32 %v1443_v14, %v513_v21  ;;  %v1445_v16 = vpop.f32.mrb[14].mxu1 }
 0x1d2   : > { %v1546_v20 = vmax.f32 %v1442_v12, 0.0  ;;  %v1446_v22 = vadd.f32 %v1445_v16, %v509_v48  ;;  %v1447_v2 = vpop.f32.mrb[15].mxu1  ;;  %v2758_v48 = vunpack.i.h.bf16 %v2756_v51 }
 0x1d3   : > { %v1448_v23 = vadd.f32 %v1447_v2, %v513_v21  ;;  %v1547_v25 = vmax.f32 %v1444_v15, 0.0  ;;  %v2771_v2 = vpop.permute.xlu1 %2770 }
 0x1d4   : > { %v1562_v24 = vmax.f32 %v1446_v22, 0.0 }
 0x1d5   : > { %v1563_v26 = vmax.f32 %v1448_v23, 0.0 }
 0x1d6   : > { %v1578_v27 = vpack.c.bf16 %v1562_v24, %v1546_v20 }
 0x1d7   : > { %v1579_v28 = vpack.c.bf16 %v1563_v26, %v1547_v25  ;;  %v2766_v26 = vpop.permute.xlu0 %2765 }
 0x1d8   : > { %2608 = vmatprep.mubr.bf16.mxu0 %v1578_v27 }
 0x1d9   : > { %2609 = vmatmul.mubr.bf16.gmra.mrb[32].mxu0 %v1579_v28 }
 0x1da   : > { %2612 = vmatprep.mubr.bf16.mxu0 %v1580_v9 }
 0x1e1   : > { %2613 = vmatmul.mubr.bf16.gmra.mrb[36].mxu0 %v1581_v10 }
 0x1ef   : > { %v1527_v62 = vpop.f32.mrb[16].mxu1 }
 0x1f0   : > { %v1528_v29 = vadd.f32 %v1527_v62, %v525_v30  ;;  %v1529_v31 = vpop.f32.mrb[17].mxu1 }
 0x1f1   : > { %v1530_v33 = vadd.f32 %v1529_v31, %v529_v61  ;;  %v1531_v34 = vpop.f32.mrb[18].mxu1 }
 0x1f2   : > { %v1532_v36 = vadd.f32 %v1531_v34, %v525_v30  ;;  %v1533_v37 = vpop.f32.mrb[19].mxu1  ;;  %v1550_v41 = vmax.f32 %v1528_v29, 0.0 }
 0x1f3   : > { %v1534_v40 = vadd.f32 %v1533_v37, %v529_v61  ;;  %v1551_v44 = vmax.f32 %v1530_v33, 0.0  ;;  %v2772_v33 = vunpack.i.l.bf16 %v2771_v2 }
 0x1f4   : > { %v1566_v43 = vmax.f32 %v1532_v36, 0.0 }
 0x1f5   : > { %v1567_v46 = vmax.f32 %v1534_v40, 0.0  ;;  %v2767_v40 = vunpack.i.l.bf16 %v2766_v26 }
 0x1f6   : > { %v1582_v32 = vpack.c.bf16 %v1566_v43, %v1550_v41  ;;  %v2773_v43 = vunpack.i.h.bf16 %v2771_v2 }
 0x1f7   : > { %v1583_v47 = vpack.c.bf16 %v1567_v46, %v1551_v44 }
 0x1f8   : > { %2616 = vmatprep.mubr.bf16.mxu0 %v1582_v32 }
 0x1f9   : > { %2617 = vmatmul.mubr.bf16.gmra.mrb[40].mxu0 %v1583_v47  ;;  %v2768_v47 = vunpack.i.h.bf16 %v2766_v26 }
 0x24c   : > { %v2590_v49 = vpop.f32.mrb[12].mxu0 }
 0x24d   : > { %v1721_v39 = vpop.f32.mrb[13].mxu0  ;;  %v1730_v53 = vadd.f32 %v2590_v49, %v3482_v52 }
 0x24e   : > { %v2591_v50 = vpop.f32.mrb[14].mxu0  ;;  %v1722_v54 = vadd.f32 %v3482_v52, %v1721_v39 }
 0x24f   : > { %v1724_v13 = vpop.f32.mrb[15].mxu0  ;;  %v1733_v57 = vadd.f32 %v2591_v50, %v3482_v52  ;;  %v1850_v38 = vmax.f32 %v1730_v53, 0.0 }
 0x250   : > { %v1725_v59 = vadd.f32 %v3482_v52, %v1724_v13  ;;  %v1848_v3 = vmax.f32 %v1722_v54, 0.0 }
 0x251   : > { %v1851_v6 = vmax.f32 %v1733_v57, 0.0  ;;  %v2159_v12 = vmul.f32 %v2751_v19, %v1850_v38 }
 0x252   : > { %v1849_v10 = vmax.f32 %v1725_v59, 0.0  ;;  %v2157_v16 = vmul.f32 %v2746_v35, %v1848_v3  ;;  %v2776_v35 = vpop.permute.xlu0 %2775 }
 0x253   : > { %v2160_v23 = vmul.f32 %v2752_v4, %v1851_v6  ;;  %v2778_v6 = vunpack.i.h.bf16 %v2776_v35 }
 0x254   : > { %v2158_v27 = vmul.f32 %v2747_v58, %v1849_v10  ;;  %v2781_v58 = vpop.permute.xlu1 %2780 }
 0x255   : > { %v2782_v19 = vunpack.i.l.bf16 %v2781_v58  ;;  %v2783_v4 = vunpack.i.h.bf16 %v2781_v58 }
 0x26c   : > { %v2594_v60 = vpop.f32.mrb[16].mxu0 }
 0x26d   : > { %v1746_v63 = vadd.f32 %v2594_v60, %v3482_v52  ;;  %v1737_v0 = vpop.f32.mrb[17].mxu0 }
 0x26e   : > { %v1738_v17 = vadd.f32 %v3482_v52, %v1737_v0  ;;  %v2595_v7 = vpop.f32.mrb[18].mxu0 }
 0x26f   : > { %v1854_v8 = vmax.f32 %v1746_v63, 0.0  ;;  %v1749_v18 = vadd.f32 %v2595_v7, %v3482_v52  ;;  %v1740_v9 = vpop.f32.mrb[19].mxu0 }
 0x270   : > { %v1852_v21 = vmax.f32 %v1738_v17, 0.0  ;;  %v1741_v11 = vadd.f32 %v3482_v52, %v1740_v9 }
 0x271   : > { %v2163_v14 = vmul.f32 %v2762_v1, %v1854_v8  ;;  %v1855_v15 = vmax.f32 %v1749_v18, 0.0  ;;  %v2777_v1 = vunpack.i.l.bf16 %v2776_v35 }
 0x272   : > { %v2161_v20 = vmul.f32 %v2757_v5, %v1852_v21  ;;  %v1853_v22 = vmax.f32 %v1741_v11, 0.0 }
 0x273   : > { %v2190_v24 = vmax.f32 %v2159_v12, %v2163_v14  ;;  %v2164_v25 = vmul.f32 %v2763_v42, %v1855_v15  ;;  %v2786_v12 = vpop.permute.xlu0 %2785 }
 0x274   : > { %v2189_v28 = vmax.f32 %v2157_v16, %v2161_v20  ;;  %v2162_v30 = vmul.f32 %v2758_v48, %v1853_v22  ;;  %v2598_v61 = vpop.f32.mrb[20].mxu0  ;;  %v2791_v48 = vpop.permute.xlu1 %2790 }
 0x275   : > { %v2205_v62 = vmax.f32 %v2160_v23, %v2164_v25  ;;  %v1762_v29 = vadd.f32 %v2598_v61, %v3482_v52  ;;  %v1753_v31 = vpop.f32.mrb[21].mxu0  ;;  %v2792_v23 = vunpack.i.l.bf16 %v2791_v48 }
 0x276   : > { %v2204_v34 = vmax.f32 %v2158_v27, %v2162_v30  ;;  %v1754_v36 = vadd.f32 %v3482_v52, %v1753_v31  ;;  %v2599_v37 = vpop.f32.mrb[22].mxu0  ;;  %v2787_v27 = vunpack.i.l.bf16 %v2786_v12  ;;  %v2793_v30 = vunpack.i.h.bf16 %v2791_v48 }
 0x277   : > { %v1858_v41 = vmax.f32 %v1762_v29, 0.0  ;;  %v1765_v44 = vadd.f32 %v2599_v37, %v3482_v52  ;;  %v1756_v46 = vpop.f32.mrb[23].mxu0  ;;  %v2788_v31 = vunpack.i.h.bf16 %v2786_v12 }
 0x278   : > { %v1856_v32 = vmax.f32 %v1754_v36, 0.0  ;;  %v1757_v49 = vadd.f32 %v3482_v52, %v1756_v46 }
 0x279   : > { %v2167_v39 = vmul.f32 %v2772_v33, %v1858_v41  ;;  %v1859_v50 = vmax.f32 %v1765_v44, 0.0 }
 0x27a   : > { %v2165_v13 = vmul.f32 %v2767_v40, %v1856_v32  ;;  %v1857_v45 = vmax.f32 %v1757_v49, 0.0  ;;  %v2801_v49 = vpop.permute.xlu1 %2800 }
 0x27b   : > { %v2192_v51 = vmax.f32 %v2190_v24, %v2167_v39  ;;  %v2168_v53 = vmul.f32 %v2773_v43, %v1859_v50 }
 0x27c   : > { %v2191_v54 = vmax.f32 %v2189_v28, %v2165_v13  ;;  %v2166_v55 = vmul.f32 %v2768_v47, %v1857_v45  ;;  %v2802_v13 = vunpack.i.l.bf16 %v2801_v49  ;;  %v2796_v45 = vpop.permute.xlu0 %2795 }
 0x27d   : > { %v2207_v56 = vmax.f32 %v2205_v62, %v2168_v53  ;;  %v2797_v53 = vunpack.i.l.bf16 %v2796_v45 }
 0x27e   : > { %v2206_v57 = vmax.f32 %v2204_v34, %v2166_v55 }
 0x28c   : > { %v2602_v59 = vpop.f32.mrb[24].mxu0 }
 0x28d   : > { %v1778_v60 = vadd.f32 %v2602_v59, %v3482_v52  ;;  %v1769_v38 = vpop.f32.mrb[25].mxu0  ;;  %v2798_v59 = vunpack.i.h.bf16 %v2796_v45 }
 0x28e   : > { %v1770_v63 = vadd.f32 %v3482_v52, %v1769_v38  ;;  %v2603_v0 = vpop.f32.mrb[26].mxu0 }
 0x28f   : > { %v1862_v3 = vmax.f32 %v1778_v60, 0.0  ;;  %v1781_v5 = vadd.f32 %v2603_v0, %v3482_v52  ;;  %v1772_v17 = vpop.f32.mrb[27].mxu0 }
 0x290   : > { %v1860_v7 = vmax.f32 %v1770_v63, 0.0  ;;  %v1773_v8 = vadd.f32 %v3482_v52, %v1772_v17 }
 0x291   : > { %v2171_v42 = vmul.f32 %v2782_v19, %v1862_v3  ;;  %v1863_v18 = vmax.f32 %v1781_v5, 0.0 }
 0x292   : > { %v2169_v9 = vmul.f32 %v2777_v1, %v1860_v7  ;;  %v1861_v10 = vmax.f32 %v1773_v8, 0.0  ;;  %v2811_v7 = vpop.permute.xlu1 %2810 }
 0x293   : > { %v2194_v21 = vmax.f32 %v2192_v51, %v2171_v42  ;;  %v2172_v11 = vmul.f32 %v2783_v4, %v1863_v18  ;;  %v2812_v42 = vunpack.i.l.bf16 %v2811_v7 }
 0x294   : > { %v2193_v14 = vmax.f32 %v2191_v54, %v2169_v9  ;;  %v2170_v15 = vmul.f32 %v2778_v6, %v1861_v10  ;;  %v2606_v16 = vpop.f32.mrb[28].mxu0 }
 0x295   : > { %v2209_v20 = vmax.f32 %v2207_v56, %v2172_v11  ;;  %v1794_v22 = vadd.f32 %v2606_v16, %v3482_v52  ;;  %v1785_v2 = vpop.f32.mrb[29].mxu0  ;;  %v2806_v11 = vpop.permute.xlu0 %2805 }
 0x296   : > { %v2208_v24 = vmax.f32 %v2206_v57, %v2170_v15  ;;  %v1786_v25 = vadd.f32 %v3482_v52, %v1785_v2  ;;  %v2607_v26 = vpop.f32.mrb[30].mxu0  ;;  %v2803_v57 = vunpack.i.h.bf16 %v2801_v49  ;;  %v2807_v16 = vunpack.i.l.bf16 %v2806_v11 }
 0x297   : > { %v1866_v28 = vmax.f32 %v1794_v22, 0.0  ;;  %v1797_v61 = vadd.f32 %v2607_v26, %v3482_v52  ;;  %v1788_v62 = vpop.f32.mrb[31].mxu0  ;;  %v2813_v2 = vunpack.i.h.bf16 %v2811_v7 }
 0x298   : > { %v1864_v29 = vmax.f32 %v1786_v25, 0.0  ;;  %v1789_v33 = vadd.f32 %v3482_v52, %v1788_v62  ;;  %v2808_v25 = vunpack.i.h.bf16 %v2806_v11 }
 0x299   : > { %v2175_v34 = vmul.f32 %v2792_v23, %v1866_v28  ;;  %v1867_v36 = vmax.f32 %v1797_v61, 0.0 }
 0x29a   : > { %v2173_v37 = vmul.f32 %v2787_v27, %v1864_v29  ;;  %v1865_v40 = vmax.f32 %v1789_v33, 0.0  ;;  %v2821_v33 = vpop.permute.xlu1 %2820 }
 0x29b   : > { %v2196_v41 = vmax.f32 %v2194_v21, %v2175_v34  ;;  %v2176_v43 = vmul.f32 %v2793_v30, %v1867_v36  ;;  %v2816_v36 = vpop.permute.xlu0 %2815 }
 0x29c   : > { %v2195_v44 = vmax.f32 %v2193_v14, %v2173_v37  ;;  %v2174_v46 = vmul.f32 %v2788_v31, %v1865_v40  ;;  %v2817_v49 = vunpack.i.l.bf16 %v2816_v36 }
 0x29d   : > { %v2211_v32 = vmax.f32 %v2209_v20, %v2176_v43 }
 0x29e   : > { %v2210_v47 = vmax.f32 %v2208_v24, %v2174_v46 }
 0x2ac   : > { %v2610_v39 = vpop.f32.mrb[32].mxu0 }
 0x2ad   : > { %v1810_v50 = vadd.f32 %v2610_v39, %v3482_v52  ;;  %v1801_v51 = vpop.f32.mrb[33].mxu0 }
 0x2ae   : > { %v1802_v54 = vadd.f32 %v3482_v52, %v1801_v51  ;;  %v2611_v55 = vpop.f32.mrb[34].mxu0 }
 0x2af   : > { %v1870_v56 = vmax.f32 %v1810_v50, 0.0  ;;  %v1813_v58 = vadd.f32 %v2611_v55, %v3482_v52  ;;  %v1804_v35 = vpop.f32.mrb[35].mxu0 }
 0x2b0   : > { %v1868_v60 = vmax.f32 %v1802_v54, 0.0  ;;  %v1805_v38 = vadd.f32 %v3482_v52, %v1804_v35 }
 0x2b1   : > { %v2179_v19 = vmul.f32 %v2802_v13, %v1870_v56  ;;  %v1871_v63 = vmax.f32 %v1813_v58, 0.0  ;;  %v2823_v13 = vunpack.i.h.bf16 %v2821_v33 }
 0x2b2   : > { %v2177_v0 = vmul.f32 %v2797_v53, %v1868_v60  ;;  %v1869_v1 = vmax.f32 %v1805_v38, 0.0  ;;  %v2818_v53 = vunpack.i.h.bf16 %v2816_v36 }
 0x2b3   : > { %v2198_v3 = vmax.f32 %v2196_v41, %v2179_v19  ;;  %v2180_v4 = vmul.f32 %v2803_v57, %v1871_v63  ;;  %v1996_v63 = vld [vmem:[#allocation3 + $0x8] sm:$0xff] }
 0x2b4   : > { %v2197_v5 = vmax.f32 %v2195_v44, %v2177_v0  ;;  %v2178_v17 = vmul.f32 %v2798_v59, %v1869_v1  ;;  %v2614_v6 = vpop.f32.mrb[36].mxu0  ;;  %v2822_v44 = vunpack.i.l.bf16 %v2821_v33  ;;  %v1995_v59 = vld [vmem:[#allocation3] sm:$0xff] }
 0x2b5   : > { %v2213_v8 = vmax.f32 %v2211_v32, %v2180_v4  ;;  %v1826_v18 = vadd.f32 %v2614_v6, %v3482_v52  ;;  %v1817_v9 = vpop.f32.mrb[37].mxu0 }
 0x2b6   : > { %v2212_v10 = vmax.f32 %v2210_v47, %v2178_v17  ;;  %v1818_v48 = vadd.f32 %v3482_v52, %v1817_v9  ;;  %v2615_v21 = vpop.f32.mrb[38].mxu0 }
 0x2b7   : > { %v1874_v12 = vmax.f32 %v1826_v18, 0.0  ;;  %v1829_v14 = vadd.f32 %v2615_v21, %v3482_v52  ;;  %v1820_v15 = vpop.f32.mrb[39].mxu0 }
 0x2b8   : > { %v1872_v20 = vmax.f32 %v1818_v48, 0.0  ;;  %v1821_v22 = vadd.f32 %v3482_v52, %v1820_v15 }
 0x2b9   : > { %v2183_v23 = vmul.f32 %v2812_v42, %v1874_v12  ;;  %v1875_v24 = vmax.f32 %v1829_v14, 0.0 }
 0x2ba   : > { %v2181_v26 = vmul.f32 %v2807_v16, %v1872_v20  ;;  %v1873_v27 = vmax.f32 %v1821_v22, 0.0 }
 0x2bb   : > { %v2200_v28 = vmax.f32 %v2198_v3, %v2183_v23  ;;  %v2184_v30 = vmul.f32 %v2813_v2, %v1875_v24 }
 0x2bc   : > { %v2199_v61 = vmax.f32 %v2197_v5, %v2181_v26  ;;  %v2182_v62 = vmul.f32 %v2808_v25, %v1873_v27 }
 0x2bd   : > { %v2215_v29 = vmax.f32 %v2213_v8, %v2184_v30 }
 0x2be   : > { %v2214_v31 = vmax.f32 %v2212_v10, %v2182_v62 }
 0x2cc   : > { %v2618_v34 = vpop.f32.mrb[40].mxu0 }
 0x2cd   : > { %v1842_v37 = vadd.f32 %v2618_v34, %v3482_v52  ;;  %v1833_v40 = vpop.f32.mrb[41].mxu0 }
 0x2ce   : > { %v1834_v41 = vadd.f32 %v3482_v52, %v1833_v40  ;;  %v2619_v43 = vpop.f32.mrb[42].mxu0 }
 0x2cf   : > { %v1878_v46 = vmax.f32 %v1842_v37, 0.0  ;;  %v1845_v32 = vadd.f32 %v2619_v43, %v3482_v52  ;;  %v1836_v47 = vpop.f32.mrb[43].mxu0 }
 0x2d0   : > { %v1876_v39 = vmax.f32 %v1834_v41, 0.0  ;;  %v1837_v50 = vadd.f32 %v3482_v52, %v1836_v47 }
 0x2d1   : > { %v2187_v45 = vmul.f32 %v2822_v44, %v1878_v46  ;;  %v1879_v51 = vmax.f32 %v1845_v32, 0.0 }
 0x2d2   : > { %v2185_v54 = vmul.f32 %v2817_v49, %v1876_v39  ;;  %v1877_v55 = vmax.f32 %v1837_v50, 0.0 }
 0x2d3   : > { %v2202_v56 = vmax.f32 %v2200_v28, %v2187_v45  ;;  %v2188_v57 = vmul.f32 %v2823_v13, %v1879_v51 }
 0x2d4   : > { %v2201_v58 = vmax.f32 %v2199_v61, %v2185_v54  ;;  %v2186_v35 = vmul.f32 %v2818_v53, %v1877_v55 }
 0x2d5   : > { %v2217_v60 = vmax.f32 %v2215_v29, %v2188_v57 }
 0x2d6   : > { %v2203_v38 = vmax.f32 %v2201_v58, %v2202_v56  ;;  %v2216_v19 = vmax.f32 %v2214_v31, %v2186_v35  ;;  %2226 = sbr.rel (%p2540_p2) target bundleno = 741 (0x2e5), region = 60 }
 0x2d8   : > { %v2219_v0 = vmax.f32 %v1995_v59, %v2203_v38  ;;  %v2218_v1 = vmax.f32 %v2216_v19, %v2217_v60 }
 0x2da   : > { %2221 = vst [vmem:[#allocation3] sm:$0xff] %v2219_v0  ;;  %v2220_v3 = vmax.f32 %v1996_v63, %v2218_v1 }
 0x2dc   : > { %2222 = vst [vmem:[#allocation3 + $0x8] sm:$0xff] %v2220_v3 }
 0x2e1   : > { %v2227_v52 = vld [vmem:[#allocation3] sm:$0xff] }
 0x2e2   : > { %2229 = vst [vmem:[%s3274_s7] sm:$0xff] %v2227_v52 }
 0x2e3   : > { %v2228_v4 = vld [vmem:[#allocation3 + $0x8] sm:$0xff] }
 0x2e4   : > { %2230 = vst [vmem:[%s3274_s7 + $0x8] sm:$0xff] %v2228_v4 }
 0x2e5 PF: > { %s3640_s8 = sld [smem:[#allocation16_spill]]  ;;  %s2547_s15 = sshll.u32 %s3005_s28, 8 }
 0x2e6   : > { %s3641_s12 = sld [smem:[#allocation21_spill]]  ;;  %s2245_s11 = sshll.u32 %s3274_s7, 4  ;;  %s3526_s11 = int_to_ptr.vmem [resolvable:$true] %s2245_s11 }
 0x2e7   : > { %s3530_s27 = scalar_lea.sflag [#allocation6], %s314_s29  ;;  %s2891_s13 = scalar_lea.vmem %s3526_s11, 256 }
 0x2e8   : > { %p2892_p3 = scmp.ne.s32.totalorder %s3526_s11, %s2891_s13  ;;  %s3028_s28 = smov [#allocation9]  }
 0x2e9   : > { %s2895_s9 = sshll.u32 %s3028_s28, 4  ;;  %s2896_s9 = int_to_ptr.vmem [resolvable:$false] %s2895_s9 }
 0x2ea   : > { %s2897_s14 = scalar_lea.vmem %s2896_s9, 512  ;;  %p2898_p0 = scmp.lt.s32.totalorder %s3526_s11, %s2896_s9 }
 0x2eb   : > { %p3642_p6 = scmp.ne.s32.totalorder %s3640_s8, 0  ;;  %p2899_p8 = scmp.lt.s32.totalorder %s2897_s14, %s2891_s13 }
 0x2ec   : > { %s3523_s18 = scalar_lea.hbm %s3641_s12, %s2547_s15 }
 0x2ed   : > { %p2893_p10 = pnand %p2892_p3, %p3642_p6  ;;  %p2900_p11 = por %p2899_p8, %p2898_p0 }
 0x2ef   : > { %p2894_p12 = pneg %p2893_p10 }
 0x2f1   : > { %p2901_p13 = pnand %p2900_p11, %p2894_p12 }
 0x2f3   : > { %2904 = shalt.err (!%p2901_p13)
}
 0x2f4   : > { %s2905_s29 = scalar_lea.hbm %s3523_s18, 256  ;;  %s2909_s21 = scalar_lea.hbm %s3641_s12, 2048 }
 0x2f5   : > { %p2906_p7 = scmp.ne.s32.totalorder %s3523_s18, %s2905_s29  ;;  %p2910_p5 = scmp.lt.u32.totalorder %s3523_s18, %s3641_s12 }
 0x2f6   : > { %p2911_p4 = scmp.lt.u32.totalorder %s2909_s21, %s2905_s29  ;;  %p2913_p3 = scmp.lt.u32.totalorder %s2905_s29, %s3523_s18 }
 0x2f7   : > { %p2907_p9 = pnand %p2906_p7, %p3642_p6 }
 0x2f8   : > { %p2912_p2 = por %p2911_p4, %p2910_p5 }
 0x2f9   : > { %p2908_p1 = pneg %p2907_p9 }
 0x2fa   : > { %p2914_p10 = por %p2913_p3, %p2912_p2 }
 0x2fc   : > { %p2915_p12 = pnand %p2914_p10, %p2908_p1 }
 0x2fe   : > { %2918 = shalt.err (!%p2915_p12)
}
 0x2ff   : > { %s3029_s16 = smov 128   ;;  %s3030_s15 = smov 8  }
 0x300   : > { %2626 = dma.vmem_to_hbm [thread:$0]  (%p3642_p6), %s3526_s11, 256, %s3523_s18, %s3530_s27, %s3029_s16, %s3029_s16, %s3030_s15  }
 0x301 PF: > { %s3643_s17 = sld [smem:[#allocation15_spill]]  ;;  %s3644_s24 = sld [smem:[#allocation13_spill]] }
 0x302   : > { %s3645_s13 = sld [smem:[#allocation17_spill]] }
 0x307   : > { %p2643_p0 = scmp.ge.s32.totalorder %s3643_s17, 2  ;;  %s2260_s28 = sand.u32 1, %s3644_s24  }
 0x308   : > { %p3646_p8 = scmp.ne.s32.totalorder %s3645_s13, 0  ;;  %s2261_s9 = scalar_lea.sflag [#allocation6], %s2260_s28 }
 0x30a   : > { %p2637_p11 = pnand %p2643_p0, %p3646_p8 }
 0x30c   : > { %2972 = dma.done.wait (!%p2637_p11), %s2261_s9, 256  }
 0x30d   : > { %2974 = vsyncadd (!%p2637_p11), %s2261_s9, 4294967040  ;;  %s23_s7 = sadd.s32 1, %s3643_s17   ;;  %s3647_s27 = sld [smem:[#allocation14_spill]] }
 0x30e   : > { %p20_p13 = scmp.ge.s32.totalorder %s23_s7, 34   ;;  %s3648_s29 = sld [smem:[#allocation18_spill]] }
 0x30f   : > { %s3649_s8 = sld [smem:[#allocation19_spill]]  ;;  %s3650_s21 = smov %s2981_s22 }
 0x310   : > { %s3651_s22 = smov %s2985_s23  ;;  %s3652_s23 = smov %s3215_s19 }
 0x311   : > { %s3653_s24 = smov %s2993_s25  ;;  %s3654_s25 = smov %s2997_s26 }
 0x312   : > { %s3655_s26 = smov %s3220_s6  ;;  %s3656_s28 = smov %s3013_s30 }
 0x313   :  { %22 = sbr.rel (!%p20_p13) target bundleno = 13 (0xd), region = 104 }
 0x315   : > { %s3657_s30 = smov %s3649_s8 }
 0x31a   :  { %2266 = vsyncpa [#allocation5], 1 }
 0x31b   :  { %2268 = vsyncpa [#allocation5 + $0x1], 1 }
 0x31c   :  { %2269 = vsyncpa [#allocation8], 1 }
 0x31d   :  { %2270 = vsyncpa [#allocation6], 1 }
 0x31e   :  { %2272 = vsyncpa [#allocation6 + $0x1], 1 }

</bundles_post_ra>
